<compile_context>
chip_gen: v5e
topology: v5e:2x2
jax: 0.10.0
libtpu: 0.0.40
codegen_flags: <defaults>
</compile_context>

<pallas_src>
import jax
import jax.numpy as jnp
from jax.experimental import pallas as pl
from jax.experimental.pallas import tpu as pltpu

# ----------------------- model hyper-parameters (static) --------------------
SLIDING_WINDOW = 7
N_HISTORY_COLS = 4          # len(history_column_names)
EXTERNAL_FLAG = False
N_EXTERNAL = 0
N_TARGET_COLS = 1           # len(target_val_column_names)  -> output_size
STACKS = 3
LAYERS = 2                  # layers per NBeatsBlock (>= 1)
LAYER_SIZE = 32
NORMALIZATION = "minmax"    # -> final sigmoid

INPUT_SIZE = (N_HISTORY_COLS + (N_EXTERNAL if EXTERNAL_FLAG else 0)) * (SLIDING_WINDOW + 1)
OUTPUT_SIZE = N_TARGET_COLS
THETA_SIZE = INPUT_SIZE + OUTPUT_SIZE

USE_BF16 = True             # bf16 weights / MXU inputs, f32 accumulation + epilogue
TILE_B = 2048               # batch rows (lanes) per grid step; multiple of 256
LANE_MULT = 256             # fills whole MXU N-tiles on v6e/v7x; multiple of 128 (v5e)


# ------------------------------- kernel -------------------------------------
def nbeats_kernel(x_ref, w_in_ref, b_in_ref, w_hid_ref, b_hid_ref,
                  w_back_ref, b_back_ref, w_fore_ref, b_fore_ref, out_ref):
    mxu_dt = w_in_ref.dtype                        # bf16 (or f32) for MXU inputs
    residuals = x_ref[...]                         # [INPUT_SIZE, TB], f32, un-flipped
    # torch: forecast = x[:, -1:]  ->  last feature row in feature-major layout
    forecast = jnp.broadcast_to(
        residuals[INPUT_SIZE - 1:INPUT_SIZE, :],
        (OUTPUT_SIZE, residuals.shape[1]))         # [OUT, TB]

    for s in range(STACKS):
        # first linear + relu (flip folded into w_in columns)
        h = jnp.dot(w_in_ref[s], residuals.astype(mxu_dt),
                    preferred_element_type=jnp.float32)          # [L, TB]
        h = jnp.maximum(h + b_in_ref[s], 0.0)                    # bias/ReLU in f32
        # remaining hidden layers + relu
        for l in range(LAYERS - 1):
            h = jnp.dot(w_hid_ref[s, l], h.astype(mxu_dt),
                        preferred_element_type=jnp.float32)
            h = jnp.maximum(h + b_hid_ref[s, l], 0.0)
        hm = h.astype(mxu_dt)
        # backcast projection (columns pre-flipped -> stays in un-flipped space)
        backcast = jnp.dot(w_back_ref[s], hm,
                           preferred_element_type=jnp.float32) + b_back_ref[s]
        # forecast head: 32 -> 1 done on VPU + cross-sublane reduce (no MXU push)
        if OUTPUT_SIZE == 1:
            block_fore = jnp.sum(w_fore_ref[s] * h, axis=0,
                                 keepdims=True) + b_fore_ref[s]  # [1, TB]
        else:
            block_fore = jnp.dot(w_fore_ref[s], hm,
                                 preferred_element_type=jnp.float32) + b_fore_ref[s]
        residuals = residuals - backcast
        forecast = forecast + block_fore

    if NORMALIZATION == "minmax":
        forecast = jax.nn.sigmoid(forecast)        # EUP, f32
    out_ref[...] = forecast.astype(out_ref.dtype)  # lane-dense [OUT, TB] store


# ------------------------------- wrapper -------------------------------------
def nbeats_forward(x, kernel_params, tile_b=TILE_B):
    """x: [B, INPUT_SIZE] f32; kernel_params from prepare_params().
    Returns [B, OUTPUT_SIZE] f32."""
    (w_in, b_in, w_hid, b_hid, w_back, b_back, w_fore, b_fore) = kernel_params

    B = x.shape[0]
    padded_b = pl.cdiv(B, LANE_MULT) * LANE_MULT          # lane-aligned batch
    tb = min(tile_b, padded_b)
    # Keep the grid at >= 2 steps when the batch allows it so v7x's two
    # TensorCores both get work (no-op on single-TC v5e/v6e).
    if padded_b >= 2 * LANE_MULT and padded_b // tb < 2:
        tb = (padded_b // 2 + LANE_MULT - 1) // LANE_MULT * LANE_MULT
    tb = max(LANE_MULT, (tb // LANE_MULT) * LANE_MULT)    # multiple of 256
    padded_b = pl.cdiv(padded_b, tb) * tb
    grid = (padded_b // tb,)

    xt = x.T                                              # [INPUT_SIZE, B] feature-major
    if padded_b != B:
        xt = jnp.pad(xt, ((0, 0), (0, padded_b - B)))

    inputs = (xt, w_in, b_in, w_hid, b_hid, w_back, b_back, w_fore, b_fore)

    def resident_spec(a):
        # full-array block; same block index every grid step -> stays in VMEM
        nd = a.ndim
        return pl.BlockSpec(a.shape, lambda i, _nd=nd: (0,) * _nd)

    in_specs = [pl.BlockSpec((INPUT_SIZE, tb), lambda i: (0, i))] + \
               [resident_spec(a) for a in inputs[1:]]
    out_spec = pl.BlockSpec((OUTPUT_SIZE, tb), lambda i: (0, i))

    flops_per_row = 2 * STACKS * (INPUT_SIZE * LAYER_SIZE
                                  + (LAYERS - 1) * LAYER_SIZE * LAYER_SIZE
                                  + LAYER_SIZE * INPUT_SIZE
                                  + LAYER_SIZE * OUTPUT_SIZE)
    param_bytes = sum(int(p.nbytes) for p in inputs[1:])
    cost = pl.CostEstimate(
        flops=padded_b * flops_per_row,
        transcendentals=padded_b * OUTPUT_SIZE,
        bytes_accessed=padded_b * (INPUT_SIZE + OUTPUT_SIZE) * 4 + param_bytes)

    out = pl.pallas_call(
        nbeats_kernel,
        out_shape=jax.ShapeDtypeStruct((OUTPUT_SIZE, padded_b), jnp.float32),
        grid=grid,
        in_specs=in_specs,
        out_specs=out_spec,
        compiler_params=pltpu.CompilerParams(
            dimension_semantics=("parallel",)),   # splits across v7x's 2 TCs
        cost_estimate=cost,
    )(*inputs)

    return out[:, :B].T                            # -> [B, OUTPUT_SIZE]


# --------------------------- parameters --------------------------------------
def init_params(key):
    """Parameters in the natural (torch-equivalent) layout: x @ W convention."""
    ks = jax.random.split(key, 6)
    scale_in = 1.0 / jnp.sqrt(INPUT_SIZE)
    scale_h = 1.0 / jnp.sqrt(LAYER_SIZE)
    w_in = jax.random.uniform(ks[0], (STACKS, INPUT_SIZE, LAYER_SIZE),
                              jnp.float32, -scale_in, scale_in)
    b_in = jax.random.uniform(ks[1], (STACKS, 1, LAYER_SIZE),
                              jnp.float32, -scale_in, scale_in)
    w_hid = jax.random.uniform(ks[2], (STACKS, max(LAYERS - 1, 1), LAYER_SIZE, LAYER_SIZE),
                               jnp.float32, -scale_h, scale_h)
    b_hid = jax.random.uniform(ks[3], (STACKS, max(LAYERS - 1, 1), 1, LAYER_SIZE),
                               jnp.float32, -scale_h, scale_h)
    w_th = jax.random.uniform(ks[4], (STACKS, LAYER_SIZE, THETA_SIZE),
                              jnp.float32, -scale_h, scale_h)
    b_th = jax.random.uniform(ks[5], (STACKS, 1, THETA_SIZE),
                              jnp.float32, -scale_h, scale_h)
    return (w_in, b_in, w_hid, b_hid, w_th, b_th)


def prepare_params(params, use_bf16=USE_BF16):
    """Fold x.flip(dims=(1,)) into the weights, transpose everything to the
    feature-major (h = W @ x) orientation, and split the theta projection.

    Residuals stay un-flipped and feature-major ([INPUT_SIZE, TB]) inside the
    kernel:
      * flip the input columns of w_in^T,
      * flip the backcast rows of w_back^T / b_back,
      * the forecast column becomes a [LAYER_SIZE, 1] f32 vector (VPU head).
    Matmul operands are optionally cast to bf16; biases / VPU weights stay f32.
    """
    w_in, b_in, w_hid, b_hid, w_th, b_th = params
    wdt = jnp.bfloat16 if use_bf16 else jnp.float32

    w_in_k = jnp.swapaxes(w_in[:, ::-1, :], 1, 2).astype(wdt)        # [S, L, IN]
    b_in_k = jnp.swapaxes(b_in, 1, 2)                                # [S, L, 1]
    w_hid_k = jnp.swapaxes(w_hid, 2, 3).astype(wdt)                  # [S, LM1, L, L]
    b_hid_k = jnp.swapaxes(b_hid, 2, 3)                              # [S, LM1, L, 1]
    w_back_k = jnp.swapaxes(w_th[:, :, :INPUT_SIZE][:, :, ::-1],
                            1, 2).astype(wdt)                        # [S, IN, L]
    b_back_k = jnp.swapaxes(b_th[:, :, :INPUT_SIZE][:, :, ::-1], 1, 2)  # [S, IN, 1]
    w_fore = w_th[:, :, THETA_SIZE - OUTPUT_SIZE:]                   # [S, L, OUT]
    b_fore_k = jnp.swapaxes(b_th[:, :, THETA_SIZE - OUTPUT_SIZE:], 1, 2)  # [S, OUT, 1]
    if OUTPUT_SIZE == 1:
        w_fore_k = w_fore.astype(jnp.float32)                        # [S, L, 1] (VPU path)
    else:
        w_fore_k = jnp.swapaxes(w_fore, 1, 2).astype(wdt)            # [S, OUT, L]
    return (w_in_k, b_in_k, w_hid_k, b_hid_k,
            w_back_k, b_back_k, w_fore_k, b_fore_k)


# --------------------------- plain-JAX reference ------------------------------
def nbeats_reference(x, params, mxu_dtype=jnp.float32):
    """Mirrors the torch forward (runtime flip, full theta projection)."""
    w_in, b_in, w_hid, b_hid, w_th, b_th = params

    def mm(a, w):
        return jnp.dot(a.astype(mxu_dtype), w.astype(mxu_dtype),
                       preferred_element_type=jnp.float32)

    residuals = x[:, ::-1]
    forecast = x[:, -1:]
    for s in range(STACKS):
        h = jnp.maximum(mm(residuals, w_in[s]) + b_in[s], 0.0)
        for l in range(LAYERS - 1):
            h = jnp.maximum(mm(h, w_hid[s, l]) + b_hid[s, l], 0.0)
        theta = mm(h, w_th[s]) + b_th[s]
        residuals = residuals - theta[:, :INPUT_SIZE]
        forecast = forecast + theta[:, THETA_SIZE - OUTPUT_SIZE:]
    if NORMALIZATION == "minmax":
        forecast = jax.nn.sigmoid(forecast)
    return forecast


if __name__ == "__main__":
    key = jax.random.PRNGKey(0)
    kx, kp = jax.random.split(key)

    BATCH = 512                     # -> two 256-lane tiles, exercises the grid
    x = jax.random.normal(kx, (BATCH, INPUT_SIZE), jnp.float32)
    params = init_params(kp)
    ref_f32 = nbeats_reference(x, params, mxu_dtype=jnp.float32)

    # f32-weight kernel: tight structural check (flip folding / transposition /
    # theta split / VPU forecast head all exactly consistent with torch math).
    out_f32 = jax.block_until_ready(
        nbeats_forward(x, prepare_params(params, use_bf16=False)))
    assert out_f32.shape == (BATCH, OUTPUT_SIZE)
    assert jnp.allclose(out_f32, ref_f32, atol=1e-4, rtol=1e-4), \
        float(jnp.max(jnp.abs(out_f32 - ref_f32)))

    # bf16-weight kernel (production path): loose check bounded by bf16
    # quantization error compounding through the residual stacks.
    out_bf16 = jax.block_until_ready(
        nbeats_forward(x, prepare_params(params, use_bf16=True)))
    assert out_bf16.shape == (BATCH, OUTPUT_SIZE)
    assert jnp.allclose(out_bf16, ref_f32, atol=3e-2, rtol=3e-2), \
        float(jnp.max(jnp.abs(out_bf16 - ref_f32)))

    # TODO(synk): loss_function (training-time masked MSE) is not part of the
    # forward pass and is not implemented as a kernel.
    print("KERNEL_OK")
</pallas_src>

<mosaic_0001>
module attributes {stable_mosaic.version = 11 : i64} {
  func.func @nbeats_kernel(%arg0: i32, %arg1: memref<32x256xf32, #tpu.memory_space<vmem>>, %arg2: memref<3x32x32xf32, #tpu.memory_space<vmem>>, %arg3: memref<3x32x1xf32, #tpu.memory_space<vmem>>, %arg4: memref<3x1x32x32xf32, #tpu.memory_space<vmem>>, %arg5: memref<3x1x32x1xf32, #tpu.memory_space<vmem>>, %arg6: memref<3x32x32xf32, #tpu.memory_space<vmem>>, %arg7: memref<3x32x1xf32, #tpu.memory_space<vmem>>, %arg8: memref<3x32x1xf32, #tpu.memory_space<vmem>>, %arg9: memref<3x1x1xf32, #tpu.memory_space<vmem>>, %arg10: memref<1x256xf32, #tpu.memory_space<vmem>>) attributes {dimension_semantics = [#tpu.dimension_semantics<parallel>], iteration_bounds = array<i64: 2>, scalar_prefetch = 0 : i64, scratch_operands = 0 : i64, tpu.core_type = #tpu.core_type<tc>, window_params = [{transform_indices = @transform_0, window_bounds = array<i64: 32, 256>}, {pipeline_mode = #tpu.pipeline_mode<synchronous>, transform_indices = @transform_1, window_bounds = array<i64: 3, 32, 32>}, {pipeline_mode = #tpu.pipeline_mode<synchronous>, transform_indices = @transform_2, window_bounds = array<i64: 3, 32, 1>}, {pipeline_mode = #tpu.pipeline_mode<synchronous>, transform_indices = @transform_3, window_bounds = array<i64: 3, 1, 32, 32>}, {pipeline_mode = #tpu.pipeline_mode<synchronous>, transform_indices = @transform_4, window_bounds = array<i64: 3, 1, 32, 1>}, {pipeline_mode = #tpu.pipeline_mode<synchronous>, transform_indices = @transform_5, window_bounds = array<i64: 3, 32, 32>}, {pipeline_mode = #tpu.pipeline_mode<synchronous>, transform_indices = @transform_6, window_bounds = array<i64: 3, 32, 1>}, {pipeline_mode = #tpu.pipeline_mode<synchronous>, transform_indices = @transform_7, window_bounds = array<i64: 3, 32, 1>}, {pipeline_mode = #tpu.pipeline_mode<synchronous>, transform_indices = @transform_8, window_bounds = array<i64: 3, 1, 1>}, {transform_indices = @transform_9, window_bounds = array<i64: 1, 256>}]} {
    %c0 = arith.constant 0 : index
    %c0_0 = arith.constant 0 : index
    %0 = vector.load %arg1[%c0, %c0_0] : memref<32x256xf32, #tpu.memory_space<vmem>>, vector<32x256xf32>
    %1 = vector.extract_strided_slice %0 {offsets = [31, 0], sizes = [1, 256], strides = [1, 1]} : vector<32x256xf32> to vector<1x256xf32>
    %c0_1 = arith.constant 0 : index
    %c0_2 = arith.constant 0 : index
    %c0_3 = arith.constant 0 : index
    %2 = vector.load %arg2[%c0_1, %c0_2, %c0_3] : memref<3x32x32xf32, #tpu.memory_space<vmem>>, vector<1x32x32xf32>
    %3 = vector.shape_cast %2 : vector<1x32x32xf32> to vector<32x32xf32>
    %cst = arith.constant dense<0.000000e+00> : vector<32x256xf32>
    %4 = tpu.matmul %3, %0, %cst {dimension_numbers = #tpu.dot_dimension_numbers<[1], [0], [0], [1], [0, 0, 1, 1], [], []>} : vector<32x32xf32>, vector<32x256xf32>, vector<32x256xf32> -> vector<32x256xf32>
    %c0_4 = arith.constant 0 : index
    %c0_5 = arith.constant 0 : index
    %c0_6 = arith.constant 0 : index
    %5 = vector.load %arg3[%c0_4, %c0_5, %c0_6] : memref<3x32x1xf32, #tpu.memory_space<vmem>>, vector<1x32x1xf32>
    %6 = vector.shape_cast %5 : vector<1x32x1xf32> to vector<32x1xf32>
    %7 = vector.broadcast %6 : vector<32x1xf32> to vector<32x256xf32>
    %8 = arith.addf %4, %7 : vector<32x256xf32>
    %cst_7 = arith.constant 0.000000e+00 : f32
    %9 = vector.broadcast %cst_7 : f32 to vector<32x256xf32>
    %10 = arith.maximumf %8, %9 : vector<32x256xf32>
    %c0_8 = arith.constant 0 : index
    %c0_9 = arith.constant 0 : index
    %c0_10 = arith.constant 0 : index
    %c0_11 = arith.constant 0 : index
    %11 = vector.load %arg4[%c0_8, %c0_9, %c0_10, %c0_11] : memref<3x1x32x32xf32, #tpu.memory_space<vmem>>, vector<1x1x32x32xf32>
    %12 = vector.shape_cast %11 : vector<1x1x32x32xf32> to vector<32x32xf32>
    %cst_12 = arith.constant dense<0.000000e+00> : vector<32x256xf32>
    %13 = tpu.matmul %12, %10, %cst_12 {dimension_numbers = #tpu.dot_dimension_numbers<[1], [0], [0], [1], [0, 0, 1, 1], [], []>} : vector<32x32xf32>, vector<32x256xf32>, vector<32x256xf32> -> vector<32x256xf32>
    %c0_13 = arith.constant 0 : index
    %c0_14 = arith.constant 0 : index
    %c0_15 = arith.constant 0 : index
    %c0_16 = arith.constant 0 : index
    %14 = vector.load %arg5[%c0_13, %c0_14, %c0_15, %c0_16] : memref<3x1x32x1xf32, #tpu.memory_space<vmem>>, vector<1x1x32x1xf32>
    %15 = vector.shape_cast %14 : vector<1x1x32x1xf32> to vector<32x1xf32>
    %16 = vector.broadcast %15 : vector<32x1xf32> to vector<32x256xf32>
    %17 = arith.addf %13, %16 : vector<32x256xf32>
    %cst_17 = arith.constant 0.000000e+00 : f32
    %18 = vector.broadcast %cst_17 : f32 to vector<32x256xf32>
    %19 = arith.maximumf %17, %18 : vector<32x256xf32>
    %c0_18 = arith.constant 0 : index
    %c0_19 = arith.constant 0 : index
    %c0_20 = arith.constant 0 : index
    %20 = vector.load %arg6[%c0_18, %c0_19, %c0_20] : memref<3x32x32xf32, #tpu.memory_space<vmem>>, vector<1x32x32xf32>
    %21 = vector.shape_cast %20 : vector<1x32x32xf32> to vector<32x32xf32>
    %cst_21 = arith.constant dense<0.000000e+00> : vector<32x256xf32>
    %22 = tpu.matmul %21, %19, %cst_21 {dimension_numbers = #tpu.dot_dimension_numbers<[1], [0], [0], [1], [0, 0, 1, 1], [], []>} : vector<32x32xf32>, vector<32x256xf32>, vector<32x256xf32> -> vector<32x256xf32>
    %c0_22 = arith.constant 0 : index
    %c0_23 = arith.constant 0 : index
    %c0_24 = arith.constant 0 : index
    %23 = vector.load %arg7[%c0_22, %c0_23, %c0_24] : memref<3x32x1xf32, #tpu.memory_space<vmem>>, vector<1x32x1xf32>
    %24 = vector.shape_cast %23 : vector<1x32x1xf32> to vector<32x1xf32>
    %25 = vector.broadcast %24 : vector<32x1xf32> to vector<32x256xf32>
    %26 = arith.addf %22, %25 : vector<32x256xf32>
    %c0_25 = arith.constant 0 : index
    %c0_26 = arith.constant 0 : index
    %c0_27 = arith.constant 0 : index
    %27 = vector.load %arg8[%c0_25, %c0_26, %c0_27] : memref<3x32x1xf32, #tpu.memory_space<vmem>>, vector<1x32x1xf32>
    %28 = vector.shape_cast %27 : vector<1x32x1xf32> to vector<32x1xf32>
    %29 = vector.broadcast %28 : vector<32x1xf32> to vector<32x256xf32>
    %30 = arith.mulf %29, %19 : vector<32x256xf32>
    %cst_28 = arith.constant dense<0.000000e+00> : vector<256xf32>
    %31 = vector.multi_reduction <add>, %30, %cst_28 [0] : vector<32x256xf32> to vector<256xf32>
    %32 = vector.shape_cast %31 : vector<256xf32> to vector<1x256xf32>
    %c0_29 = arith.constant 0 : index
    %c0_30 = arith.constant 0 : index
    %c0_31 = arith.constant 0 : index
    %33 = vector.load %arg9[%c0_29, %c0_30, %c0_31] : memref<3x1x1xf32, #tpu.memory_space<vmem>>, vector<1x1x1xf32>
    %34 = vector.shape_cast %33 : vector<1x1x1xf32> to vector<1x1xf32>
    %35 = vector.broadcast %34 : vector<1x1xf32> to vector<1x256xf32>
    %36 = arith.addf %32, %35 : vector<1x256xf32>
    %37 = arith.subf %0, %26 : vector<32x256xf32>
    %38 = arith.addf %1, %36 : vector<1x256xf32>
    %c1 = arith.constant 1 : index
    %c0_32 = arith.constant 0 : index
    %c0_33 = arith.constant 0 : index
    %39 = vector.load %arg2[%c1, %c0_32, %c0_33] : memref<3x32x32xf32, #tpu.memory_space<vmem>>, vector<1x32x32xf32>
    %40 = vector.shape_cast %39 : vector<1x32x32xf32> to vector<32x32xf32>
    %cst_34 = arith.constant dense<0.000000e+00> : vector<32x256xf32>
    %41 = tpu.matmul %40, %37, %cst_34 {dimension_numbers = #tpu.dot_dimension_numbers<[1], [0], [0], [1], [0, 0, 1, 1], [], []>} : vector<32x32xf32>, vector<32x256xf32>, vector<32x256xf32> -> vector<32x256xf32>
    %c1_35 = arith.constant 1 : index
    %c0_36 = arith.constant 0 : index
    %c0_37 = arith.constant 0 : index
    %42 = vector.load %arg3[%c1_35, %c0_36, %c0_37] : memref<3x32x1xf32, #tpu.memory_space<vmem>>, vector<1x32x1xf32>
    %43 = vector.shape_cast %42 : vector<1x32x1xf32> to vector<32x1xf32>
    %44 = vector.broadcast %43 : vector<32x1xf32> to vector<32x256xf32>
    %45 = arith.addf %41, %44 : vector<32x256xf32>
    %cst_38 = arith.constant 0.000000e+00 : f32
    %46 = vector.broadcast %cst_38 : f32 to vector<32x256xf32>
    %47 = arith.maximumf %45, %46 : vector<32x256xf32>
    %c1_39 = arith.constant 1 : index
    %c0_40 = arith.constant 0 : index
    %c0_41 = arith.constant 0 : index
    %c0_42 = arith.constant 0 : index
    %48 = vector.load %arg4[%c1_39, %c0_40, %c0_41, %c0_42] : memref<3x1x32x32xf32, #tpu.memory_space<vmem>>, vector<1x1x32x32xf32>
    %49 = vector.shape_cast %48 : vector<1x1x32x32xf32> to vector<32x32xf32>
    %cst_43 = arith.constant dense<0.000000e+00> : vector<32x256xf32>
    %50 = tpu.matmul %49, %47, %cst_43 {dimension_numbers = #tpu.dot_dimension_numbers<[1], [0], [0], [1], [0, 0, 1, 1], [], []>} : vector<32x32xf32>, vector<32x256xf32>, vector<32x256xf32> -> vector<32x256xf32>
    %c1_44 = arith.constant 1 : index
    %c0_45 = arith.constant 0 : index
    %c0_46 = arith.constant 0 : index
    %c0_47 = arith.constant 0 : index
    %51 = vector.load %arg5[%c1_44, %c0_45, %c0_46, %c0_47] : memref<3x1x32x1xf32, #tpu.memory_space<vmem>>, vector<1x1x32x1xf32>
    %52 = vector.shape_cast %51 : vector<1x1x32x1xf32> to vector<32x1xf32>
    %53 = vector.broadcast %52 : vector<32x1xf32> to vector<32x256xf32>
    %54 = arith.addf %50, %53 : vector<32x256xf32>
    %cst_48 = arith.constant 0.000000e+00 : f32
    %55 = vector.broadcast %cst_48 : f32 to vector<32x256xf32>
    %56 = arith.maximumf %54, %55 : vector<32x256xf32>
    %c1_49 = arith.constant 1 : index
    %c0_50 = arith.constant 0 : index
    %c0_51 = arith.constant 0 : index
    %57 = vector.load %arg6[%c1_49, %c0_50, %c0_51] : memref<3x32x32xf32, #tpu.memory_space<vmem>>, vector<1x32x32xf32>
    %58 = vector.shape_cast %57 : vector<1x32x32xf32> to vector<32x32xf32>
    %cst_52 = arith.constant dense<0.000000e+00> : vector<32x256xf32>
    %59 = tpu.matmul %58, %56, %cst_52 {dimension_numbers = #tpu.dot_dimension_numbers<[1], [0], [0], [1], [0, 0, 1, 1], [], []>} : vector<32x32xf32>, vector<32x256xf32>, vector<32x256xf32> -> vector<32x256xf32>
    %c1_53 = arith.constant 1 : index
    %c0_54 = arith.constant 0 : index
    %c0_55 = arith.constant 0 : index
    %60 = vector.load %arg7[%c1_53, %c0_54, %c0_55] : memref<3x32x1xf32, #tpu.memory_space<vmem>>, vector<1x32x1xf32>
    %61 = vector.shape_cast %60 : vector<1x32x1xf32> to vector<32x1xf32>
    %62 = vector.broadcast %61 : vector<32x1xf32> to vector<32x256xf32>
    %63 = arith.addf %59, %62 : vector<32x256xf32>
    %c1_56 = arith.constant 1 : index
    %c0_57 = arith.constant 0 : index
    %c0_58 = arith.constant 0 : index
    %64 = vector.load %arg8[%c1_56, %c0_57, %c0_58] : memref<3x32x1xf32, #tpu.memory_space<vmem>>, vector<1x32x1xf32>
    %65 = vector.shape_cast %64 : vector<1x32x1xf32> to vector<32x1xf32>
    %66 = vector.broadcast %65 : vector<32x1xf32> to vector<32x256xf32>
    %67 = arith.mulf %66, %56 : vector<32x256xf32>
    %cst_59 = arith.constant dense<0.000000e+00> : vector<256xf32>
    %68 = vector.multi_reduction <add>, %67, %cst_59 [0] : vector<32x256xf32> to vector<256xf32>
    %69 = vector.shape_cast %68 : vector<256xf32> to vector<1x256xf32>
    %c1_60 = arith.constant 1 : index
    %c0_61 = arith.constant 0 : index
    %c0_62 = arith.constant 0 : index
    %70 = vector.load %arg9[%c1_60, %c0_61, %c0_62] : memref<3x1x1xf32, #tpu.memory_space<vmem>>, vector<1x1x1xf32>
    %71 = vector.shape_cast %70 : vector<1x1x1xf32> to vector<1x1xf32>
    %72 = vector.broadcast %71 : vector<1x1xf32> to vector<1x256xf32>
    %73 = arith.addf %69, %72 : vector<1x256xf32>
    %74 = arith.subf %37, %63 : vector<32x256xf32>
    %75 = arith.addf %38, %73 : vector<1x256xf32>
    %c2 = arith.constant 2 : index
    %c0_63 = arith.constant 0 : index
    %c0_64 = arith.constant 0 : index
    %76 = vector.load %arg2[%c2, %c0_63, %c0_64] : memref<3x32x32xf32, #tpu.memory_space<vmem>>, vector<1x32x32xf32>
    %77 = vector.shape_cast %76 : vector<1x32x32xf32> to vector<32x32xf32>
    %cst_65 = arith.constant dense<0.000000e+00> : vector<32x256xf32>
    %78 = tpu.matmul %77, %74, %cst_65 {dimension_numbers = #tpu.dot_dimension_numbers<[1], [0], [0], [1], [0, 0, 1, 1], [], []>} : vector<32x32xf32>, vector<32x256xf32>, vector<32x256xf32> -> vector<32x256xf32>
    %c2_66 = arith.constant 2 : index
    %c0_67 = arith.constant 0 : index
    %c0_68 = arith.constant 0 : index
    %79 = vector.load %arg3[%c2_66, %c0_67, %c0_68] : memref<3x32x1xf32, #tpu.memory_space<vmem>>, vector<1x32x1xf32>
    %80 = vector.shape_cast %79 : vector<1x32x1xf32> to vector<32x1xf32>
    %81 = vector.broadcast %80 : vector<32x1xf32> to vector<32x256xf32>
    %82 = arith.addf %78, %81 : vector<32x256xf32>
    %cst_69 = arith.constant 0.000000e+00 : f32
    %83 = vector.broadcast %cst_69 : f32 to vector<32x256xf32>
    %84 = arith.maximumf %82, %83 : vector<32x256xf32>
    %c2_70 = arith.constant 2 : index
    %c0_71 = arith.constant 0 : index
    %c0_72 = arith.constant 0 : index
    %c0_73 = arith.constant 0 : index
    %85 = vector.load %arg4[%c2_70, %c0_71, %c0_72, %c0_73] : memref<3x1x32x32xf32, #tpu.memory_space<vmem>>, vector<1x1x32x32xf32>
    %86 = vector.shape_cast %85 : vector<1x1x32x32xf32> to vector<32x32xf32>
    %cst_74 = arith.constant dense<0.000000e+00> : vector<32x256xf32>
    %87 = tpu.matmul %86, %84, %cst_74 {dimension_numbers = #tpu.dot_dimension_numbers<[1], [0], [0], [1], [0, 0, 1, 1], [], []>} : vector<32x32xf32>, vector<32x256xf32>, vector<32x256xf32> -> vector<32x256xf32>
    %c2_75 = arith.constant 2 : index
    %c0_76 = arith.constant 0 : index
    %c0_77 = arith.constant 0 : index
    %c0_78 = arith.constant 0 : index
    %88 = vector.load %arg5[%c2_75, %c0_76, %c0_77, %c0_78] : memref<3x1x32x1xf32, #tpu.memory_space<vmem>>, vector<1x1x32x1xf32>
    %89 = vector.shape_cast %88 : vector<1x1x32x1xf32> to vector<32x1xf32>
    %90 = vector.broadcast %89 : vector<32x1xf32> to vector<32x256xf32>
    %91 = arith.addf %87, %90 : vector<32x256xf32>
    %cst_79 = arith.constant 0.000000e+00 : f32
    %92 = vector.broadcast %cst_79 : f32 to vector<32x256xf32>
    %93 = arith.maximumf %91, %92 : vector<32x256xf32>
    %c2_80 = arith.constant 2 : index
    %c0_81 = arith.constant 0 : index
    %c0_82 = arith.constant 0 : index
    %94 = vector.load %arg8[%c2_80, %c0_81, %c0_82] : memref<3x32x1xf32, #tpu.memory_space<vmem>>, vector<1x32x1xf32>
    %95 = vector.shape_cast %94 : vector<1x32x1xf32> to vector<32x1xf32>
    %96 = vector.broadcast %95 : vector<32x1xf32> to vector<32x256xf32>
    %97 = arith.mulf %96, %93 : vector<32x256xf32>
    %cst_83 = arith.constant dense<0.000000e+00> : vector<256xf32>
    %98 = vector.multi_reduction <add>, %97, %cst_83 [0] : vector<32x256xf32> to vector<256xf32>
    %99 = vector.shape_cast %98 : vector<256xf32> to vector<1x256xf32>
    %c2_84 = arith.constant 2 : index
    %c0_85 = arith.constant 0 : index
    %c0_86 = arith.constant 0 : index
    %100 = vector.load %arg9[%c2_84, %c0_85, %c0_86] : memref<3x1x1xf32, #tpu.memory_space<vmem>>, vector<1x1x1xf32>
    %101 = vector.shape_cast %100 : vector<1x1x1xf32> to vector<1x1xf32>
    %102 = vector.broadcast %101 : vector<1x1xf32> to vector<1x256xf32>
    %103 = arith.addf %99, %102 : vector<1x256xf32>
    %104 = arith.addf %75, %103 : vector<1x256xf32>
    %105 = arith.negf %104 : vector<1x256xf32>
    %106 = math.exp %105 : vector<1x256xf32>
    %cst_87 = arith.constant 1.000000e+00 : f32
    %107 = vector.broadcast %cst_87 : f32 to vector<1x256xf32>
    %108 = arith.addf %107, %106 : vector<1x256xf32>
    %109 = arith.divf %107, %108 : vector<1x256xf32>
    %c0_88 = arith.constant 0 : index
    %c0_89 = arith.constant 0 : index
    %110 = vector.load %arg10[%c0_88, %c0_89] : memref<1x256xf32, #tpu.memory_space<vmem>>, vector<1x256xf32>
    tpu.vector_store %arg10[%c0_88, %c0_89], %109 {strides = array<i32>} : memref<1x256xf32, #tpu.memory_space<vmem>>, vector<1x256xf32>,
    return
  }
  func.func @transform_0(%arg0: i32) -> (i32, i32) {
    %c0_i32 = arith.constant 0 : i32
    %c0_i32_0 = arith.constant 0 : i32
    return %c0_i32, %arg0 : i32, i32
  }
  func.func @transform_1(%arg0: i32) -> (i32, i32, i32) {
    %c0_i32 = arith.constant 0 : i32
    %c0_i32_0 = arith.constant 0 : i32
    %c0_i32_1 = arith.constant 0 : i32
    %c0_i32_2 = arith.constant 0 : i32
    return %c0_i32, %c0_i32_0, %c0_i32_1 : i32, i32, i32
  }
  func.func @transform_2(%arg0: i32) -> (i32, i32, i32) {
    %c0_i32 = arith.constant 0 : i32
    %c0_i32_0 = arith.constant 0 : i32
    %c0_i32_1 = arith.constant 0 : i32
    %c0_i32_2 = arith.constant 0 : i32
    return %c0_i32, %c0_i32_0, %c0_i32_1 : i32, i32, i32
  }
  func.func @transform_3(%arg0: i32) -> (i32, i32, i32, i32) {
    %c0_i32 = arith.constant 0 : i32
    %c0_i32_0 = arith.constant 0 : i32
    %c0_i32_1 = arith.constant 0 : i32
    %c0_i32_2 = arith.constant 0 : i32
    %c0_i32_3 = arith.constant 0 : i32
    return %c0_i32, %c0_i32_0, %c0_i32_1, %c0_i32_2 : i32, i32, i32, i32
  }
  func.func @transform_4(%arg0: i32) -> (i32, i32, i32, i32) {
    %c0_i32 = arith.constant 0 : i32
    %c0_i32_0 = arith.constant 0 : i32
    %c0_i32_1 = arith.constant 0 : i32
    %c0_i32_2 = arith.constant 0 : i32
    %c0_i32_3 = arith.constant 0 : i32
    return %c0_i32, %c0_i32_0, %c0_i32_1, %c0_i32_2 : i32, i32, i32, i32
  }
  func.func @transform_5(%arg0: i32) -> (i32, i32, i32) {
    %c0_i32 = arith.constant 0 : i32
    %c0_i32_0 = arith.constant 0 : i32
    %c0_i32_1 = arith.constant 0 : i32
    %c0_i32_2 = arith.constant 0 : i32
    return %c0_i32, %c0_i32_0, %c0_i32_1 : i32, i32, i32
  }
  func.func @transform_6(%arg0: i32) -> (i32, i32, i32) {
    %c0_i32 = arith.constant 0 : i32
    %c0_i32_0 = arith.constant 0 : i32
    %c0_i32_1 = arith.constant 0 : i32
    %c0_i32_2 = arith.constant 0 : i32
    return %c0_i32, %c0_i32_0, %c0_i32_1 : i32, i32, i32
  }
  func.func @transform_7(%arg0: i32) -> (i32, i32, i32) {
    %c0_i32 = arith.constant 0 : i32
    %c0_i32_0 = arith.constant 0 : i32
    %c0_i32_1 = arith.constant 0 : i32
    %c0_i32_2 = arith.constant 0 : i32
    return %c0_i32, %c0_i32_0, %c0_i32_1 : i32, i32, i32
  }
  func.func @transform_8(%arg0: i32) -> (i32, i32, i32) {
    %c0_i32 = arith.constant 0 : i32
    %c0_i32_0 = arith.constant 0 : i32
    %c0_i32_1 = arith.constant 0 : i32
    %c0_i32_2 = arith.constant 0 : i32
    return %c0_i32, %c0_i32_0, %c0_i32_1 : i32, i32, i32
  }
  func.func @transform_9(%arg0: i32) -> (i32, i32) {
    %c0_i32 = arith.constant 0 : i32
    %c0_i32_0 = arith.constant 0 : i32
    return %c0_i32, %arg0 : i32, i32
  }
}

</mosaic_0001>

<bundles_post_ra>
// kernel: tpu_custom_call.1
= control target key start
LH: loop header
LB: loop body
LE: loop exit
PB: predicated region body
PF: predicated region fallthrough
CT: control target
= control target key end

     0   :  { %14 = vsyncpa [#allocation4], 0  ;;  %s2515_s0 = inlined_call_operand.vmem [shape: f32[32,512], index: 0, kind: input, shape index: {}]   ;;  %s2516_s1 = inlined_call_operand.vmem [shape: f32[3,32,32], index: 1, kind: input, shape index: {}]   ;;  %s2517_s2 = inlined_call_operand.vmem [shape: f32[3,32,1], index: 2, kind: input, shape index: {}]   ;;  %s2518_s3 = inlined_call_operand.vmem [shape: f32[3,1,32,32], index: 3, kind: input, shape index: {}]   ;;  %s2519_s4 = inlined_call_operand.vmem [shape: f32[3,1,32,1], index: 4, kind: input, shape index: {}]   ;;  %s2520_s5 = inlined_call_operand.hbm [shape: f32[3,32,32], index: 5, kind: input, shape index: {}]   ;;  %s2521_s6 = inlined_call_operand.vmem [shape: f32[3,32,1], index: 6, kind: input, shape index: {}]   ;;  %s2522_s7 = inlined_call_operand.vmem [shape: f32[3,32,1], index: 7, kind: input, shape index: {}]   ;;  %s2523_s8 = inlined_call_operand.vmem [shape: f32[3,1,1], index: 8, kind: input, shape index: {}]   ;;  %s2524_s9 = inlined_call_operand.hbm [shape: f32[1,512], index: 9, kind: output, shape index: {}]  }
   0x1   :  { %15 = vsyncpa [#allocation5], 0 }
   0x2   :  { %17 = vsyncpa [#allocation5 + $0x1], 0  ;;  %s1925_s30 = smov 0   ;;  %s1927_s10 = smov 0  }
   0x3   :  { %s1929_s11 = smov 0   ;;  %s1931_s12 = smov 0  }
   0x4 LB: > { %s1946_s13 = sadd.s32 4294967295, %s1869_s12   ;;  %s1581_s14 = sadd.s32 4294967294, %s1869_s12   ;;  %s1869_s12 = sphi %s1931_s12, %s2532_s12   ;;  %s1865_s11 = sphi %s1929_s11, %s2531_s11   ;;  %s1861_s10 = sphi %s1927_s10, %s2530_s10   ;;  %s1857_s30 = sphi %s1925_s30, %s2529_s30  }
   0x5   : > { %s1950_s15 = sadd.s32 1, %s1869_s12   ;;  %s30_s16 = sadd.s32 1, %s1865_s11 }
   0x6   : > { %s27_s17 = ssub.s32 %s1869_s12, %s1950_s15  ;;  %p37_p0 = scmp.ne.s32.totalorder %s1865_s11, %s1861_s10 }
   0x7   : > { %p28_p1 = scmp.eq.s32.totalorder %s27_s17, 0  ;;  %p38_p2 = scmp.eq.s32.totalorder %s1869_s12, 0 }
   0x8   : > { %p235_p3 = scmp.eq.s32.totalorder %s1946_s13, 1  ;;  %p240_p4 = scmp.ne.s32.totalorder %s1861_s10, %s1857_s30 }
   0x9   : > { %s1962_s18 = scalar_select %p28_p1, %s1865_s11, %s30_s16  }
   0xa   : > { %p1964_p5 = por %p38_p2, %p37_p0  ;;  %p1968_p6 = por %p235_p3, %p37_p0 }
   0xb   : > { %p241_p7 = scmp.eq.s32.totalorder %s1581_s14, 1  ;;  %p1582_p8 = scmp.ge.s32.totalorder %s1869_s12, 1 }
   0xc   : > { %p248_p9 = scmp.lt.s32.totalorder %s1869_s12, 3  ;;  %p1723_p11 = scmp.eq.s32.totalorder %s1946_s13, 0 }
   0xd   : > { %p1974_p10 = por %p241_p7, %p240_p4  ;;  %s271_s25 = sshll.u32 %s2520_s5, 4  ;;  %s272_s25 = int_to_ptr.hbm [resolvable:$true] %s271_s25 }
   0xe   : > { %p1979_p12 = pnand %p1582_p8, %p248_p9  ;;  %s1871_s26 = smov [#allocation3]  }
   0xf   : > { %s273_s27 = sshll.u32 %s1871_s26, 4  ;;  %s1872_s28 = smov 128   ;;  %s274_s27 = int_to_ptr.vmem [resolvable:$true] %s273_s27 }
  0x10   : > { %p1715_p13 = pneg %p1979_p12  ;;  %s1873_s29 = smov 8  }
  0x11   : > { %p1584_p1 = scmp.ge.s32.totalorder %s1869_s12, 2 }
  0x12   : > { %p1716_p0 = pnand %p1723_p11, %p1715_p13 }
  0x13   : > { %292 = sbr.rel (%p1584_p1) target bundleno = 36 (0x24), region = 48 }
  0x14   : > { %1718 = dma.hbm_to_vmem [thread:$0]  (!%p1716_p0), %s272_s25, 1536, %s274_s27, [#allocation4], %s1872_s28, %s1872_s28, %s1873_s29  }
  0x18   : > { %295 = sbr.rel (!%p1964_p5) target bundleno = 36 (0x24), region = 52  ;;  %s297_s14 = sand.u32 (%p1964_p5), 1, %s1865_s11  }
  0x19   : > { %s1708_s16 = sshll.u32 (%p1964_p5), %s1869_s12, 4  ;;  %s1585_s17 = sshll.u32 (%p1964_p5), %s297_s14, 6 }
  0x1a   : > { %s302_s26 = scalar_lea.vmem (%p1964_p5), %s2515_s0, %s1708_s16  ;;  %s299_s25 = scalar_lea.vmem (%p1964_p5), [#allocation2], %s1585_s17 }
  0x1b   : > { %v315_v0 = vld [vmem:[%s302_s26] sm:$0xff] (%p1964_p5)  ;;  %v317_v1 = vld [vmem:[%s302_s26 + $0x8] sm:$0xff] (%p1964_p5) }
  0x1c   : > { %v319_v2 = vld [vmem:[%s302_s26 + $0x20] sm:$0xff] (%p1964_p5)  ;;  %316 = vst [vmem:[%s299_s25] sm:$0xff] (%p1964_p5), %v315_v0  ;;  %v321_v3 = vld [vmem:[%s302_s26 + $0x28] sm:$0xff] (%p1964_p5) }
  0x1d   : > { %318 = vst [vmem:[%s299_s25 + $0x8] sm:$0xff] %v317_v1  ;;  %v323_v4 = vld [vmem:[%s302_s26 + $0x40] sm:$0xff]  ;;  %v325_v5 = vld [vmem:[%s302_s26 + $0x48] sm:$0xff] }
  0x1e   : > { %320 = vst [vmem:[%s299_s25 + $0x10] sm:$0xff] %v319_v2  ;;  %v327_v6 = vld [vmem:[%s302_s26 + $0x60] sm:$0xff]  ;;  %v329_v7 = vld [vmem:[%s302_s26 + $0x68] sm:$0xff] }
  0x1f   : > { %322 = vst [vmem:[%s299_s25 + $0x18] sm:$0xff] %v321_v3 }
  0x20   : > { %324 = vst [vmem:[%s299_s25 + $0x20] sm:$0xff] %v323_v4 }
  0x21   : > { %326 = vst [vmem:[%s299_s25 + $0x28] sm:$0xff] %v325_v5 }
  0x22   : > { %328 = vst [vmem:[%s299_s25 + $0x30] sm:$0xff] %v327_v6 }
  0x23   : > { %330 = vst [vmem:[%s299_s25 + $0x38] sm:$0xff] %v329_v7 }
  0x24 PF: > { %339 = sbr.rel (%p1979_p12) target bundleno = 1417 (0x589), region = 75  ;;  %s2003_s19 = sand.u32 (!%p1979_p12), 1, %s1861_s10  }
  0x25   : > { %s1589_s27 = sshll.u32 (!%p1979_p12), %s2003_s19, 6 }
  0x26   : > { %s344_s28 = scalar_lea.vmem (!%p1979_p12), [#allocation2], %s1589_s27 }
  0x29   : > { %1848 = dma.done.wait (%p1723_p11), [#allocation4], 1536  }
  0x2a   : > { %1850 = vsyncadd (%p1723_p11), [#allocation4], 4294965760  ;;  %v1874_v8 = vmov 0   ;;  %v399_v9 = vld [vmem:[%s2517_s2 + $0x18] sm:$0xff]  ;;  %v397_v10 = vld [vmem:[%s2517_s2 + $0x8] sm:$0xff]  ;;  %vm420_vm0 = vcmask 261120  }
  0x2b   : > { %1763 = vset.pattern.permute.xlu1 %v1874_v8  ;;  %1762 = vset.pattern.permute.xlu0 %v1874_v8  ;;  %v2016_v11 = vld [vmem:[%s344_s28 + $0x30] sm:$0xff]  ;;  %v2018_v12 = vld [vmem:[%s344_s28 + $0x38] sm:$0xff]  ;;  %v2020_v13 = vld [vmem:[%s344_s28 + $0x20] sm:$0xff]  ;;  %s1705_s29 = sshll.u32 %s1946_s13, 1  ;;  %s1489_s13 = scalar_lea.sflag [#allocation5], %s2003_s19 }
  0x2c   : > { %1764 = vset.pattern.permute.xlu2 %v1874_v8  ;;  %417 = vperm.xlu0 %1762, %v399_v9   ;;  %v2022_v14 = vld [vmem:[%s344_s28 + $0x28] sm:$0xff]  ;;  %v2026_v15 = vld [vmem:[%s344_s28 + $0x10] sm:$0xff]  ;;  %v2028_v16 = vld [vmem:[%s344_s28 + $0x18] sm:$0xff]  ;;  %s1499_s16 = scalar_lea.hbm %s2524_s9, %s1705_s29  ;;  %s1823_s29 = scalar_lea.hbm %s2524_s9, 4 }
  0x2d   : > { %407 = vperm.xlu1 %1763, %v397_v10   ;;  %445 = vmatpush.msra.mxu0 %v2016_v11  ;;  %v2032_v17 = vld [vmem:[%s344_s28] sm:$0xff]  ;;  %v2034_v18 = vld [vmem:[%s344_s28 + $0x8] sm:$0xff]  ;;  %v392_v19 = vld [vmem:[%s2516_s1] sm:$0xff]  ;;  %s1591_s28 = sshll.u32 %s2003_s19, 1  ;;  %s1503_s24 = sshll.u32 %s1499_s16, 4  ;;  %s1504_s24 = int_to_ptr.hbm [resolvable:$true] %s1503_s24 }
  0x2e   : > { %474 = vmatpush.msra.mxu1 %v2018_v12  ;;  %v398_v20 = vld [vmem:[%s2517_s2 + $0x10] sm:$0xff]  ;;  %v396_v21 = vld [vmem:[%s2517_s2] sm:$0xff]  ;;  %v393_v22 = vld [vmem:[%s2516_s1 + $0x8] sm:$0xff]  ;;  %s381_s17 = scalar_lea.vmem [#allocation6], %s1591_s28  ;;  %s1817_s26 = sshra.s32 %s1504_s24, 4  ;;  %s1818_s26 = int_to_ptr.hbm [resolvable:$true] %s1817_s26 }
  0x2f   : > { %446 = vmatpush.msra.mxu0 %v2020_v13  ;;  %v504_v23 = vld [vmem:[%s2519_s4 + $0x8] sm:$0xff]  ;;  %v503_v24 = vld [vmem:[%s2519_s4] sm:$0xff]  ;;  %v394_v25 = vld [vmem:[%s2516_s1 + $0x10] sm:$0xff]  ;;  %s1501_s23 = sshll.u32 %s381_s17, 4  ;;  %s1819_s25 = scalar_lea.hbm %s1818_s26, 2  ;;  %s1502_s23 = int_to_ptr.vmem [resolvable:$true] %s1501_s23 }
  0x30   : > { %475 = vmatpush.msra.mxu1 %v2022_v14  ;;  %v611_v26 = vld [vmem:[%s2521_s6 + $0x10] sm:$0xff]  ;;  %v610_v27 = vld [vmem:[%s2521_s6 + $0x8] sm:$0xff]  ;;  %v395_v28 = vld [vmem:[%s2516_s1 + $0x18] sm:$0xff]  ;;  %p1820_p2 = scmp.ne.s32.totalorder %s1818_s26, %s1819_s25  ;;  %p1824_p5 = scmp.lt.s32.totalorder %s1818_s26, %s2524_s9 }
  0x31   : > { %447 = vmatpush.msra.mxu0 %v2026_v15  ;;  %v1623_v29 = vld [vmem:[%s2517_s2 + $0x38] sm:$0xff]  ;;  %v1622_v30 = vld [vmem:[%s2517_s2 + $0x30] sm:$0xff]  ;;  %v1620_v31 = vld [vmem:[%s2517_s2 + $0x20] sm:$0xff]  ;;  %p1825_p7 = scmp.lt.s32.totalorder %s1823_s29, %s1819_s25 }
  0x32   : > { %476 = vmatpush.msra.mxu1 %v2028_v16  ;;  %v1639_v32 = vld [vmem:[%s2519_s4 + $0x38] sm:$0xff]  ;;  %v1637_v33 = vld [vmem:[%s2519_s4 + $0x28] sm:$0xff]  ;;  %v1636_v34 = vld [vmem:[%s2519_s4 + $0x20] sm:$0xff]  ;;  %p1821_p3 = pnand %p1820_p2, %p1968_p6 }
  0x33   : > { %448 = vmatpush.msra.mxu0 %v2032_v17  ;;  %v1650_v35 = vld [vmem:[%s2521_s6 + $0x30] sm:$0xff]  ;;  %v1649_v36 = vld [vmem:[%s2521_s6 + $0x28] sm:$0xff]  ;;  %v1672_v37 = vld [vmem:[%s2517_s2 + $0x58] sm:$0xff]  ;;  %p1826_p8 = por %p1825_p7, %p1824_p5 }
  0x34   : > { %477 = vmatpush.msra.mxu1 %v2034_v18  ;;  %1592 = vmatmul.msk.f32.vlgmr.msra.gmra.mxu0 %vm420_vm0, %v392_v19  ;;  %v1671_v38 = vld [vmem:[%s2517_s2 + $0x50] sm:$0xff]  ;;  %v1669_v39 = vld [vmem:[%s2517_s2 + $0x40] sm:$0xff]  ;;  %v1686_v42 = vld [vmem:[%s2519_s4 + $0x48] sm:$0xff]  ;;  %p1822_p4 = pneg %p1821_p3 }
  0x35   : > { %1596 = vmatmul.msk.f32.vlgmr.msra.gmra.mxu1 %vm420_vm0, %v392_v19  ;;  %412 = vperm.xlu0 %1762, %v398_v20   ;;  %v703_v40 = vld [vmem:[%s2522_s7] sm:$0xff]  ;;  %v506_v43 = vld [vmem:[%s2519_s4 + $0x18] sm:$0xff]  ;;  %v1661_v45 = vld [vmem:[%s2522_s7 + $0x28] sm:$0xff] }
  0x36   : > { %402 = vperm.xlu1 %1763, %v396_v21   ;;  %v1685_v41 = vld [vmem:[%s2519_s4 + $0x40] sm:$0xff]  ;;  %524 = vperm.xlu2 %1764, %v506_v43   ;;  %v505_v46 = vld [vmem:[%s2519_s4 + $0x10] sm:$0xff]  ;;  %v706_v47 = vld [vmem:[%s2522_s7 + $0x18] sm:$0xff]  ;;  %p1827_p9 = pnand %p1826_p8, %p1822_p4 }
  0x37   : > { %v1660_v44 = vld [vmem:[%s2522_s7 + $0x20] sm:$0xff]  ;;  %v1662_v48 = vld [vmem:[%s2522_s7 + $0x30] sm:$0xff]  ;;  %v612_v49 = vld [vmem:[%s2521_s6 + $0x18] sm:$0xff] }
  0x38   : > { %v1697_v50 = vld [vmem:[%s2522_s7 + $0x40] sm:$0xff]  ;;  %v1698_v51 = vld [vmem:[%s2522_s7 + $0x48] sm:$0xff]  ;;  %v1699_v53 = vld [vmem:[%s2522_s7 + $0x50] sm:$0xff] }
  0x39   : > { %v609_v52 = vld [vmem:[%s2521_s6] sm:$0xff]  ;;  %v1700_v54 = vld [vmem:[%s2522_s7 + $0x58] sm:$0xff]  ;;  %v1621_v55 = vld [vmem:[%s2517_s2 + $0x28] sm:$0xff] }
  0x3a   : > { %v1664_v56 = vld [vmem:[%s2523_s8 + $0x1] sm:$0x1]  ;;  %v1701_v57 = vld [vmem:[%s2523_s8 + $0x2] sm:$0x1]  ;;  %v1638_v58 = vld [vmem:[%s2519_s4 + $0x30] sm:$0xff] }
  0x3b   : > { %v1651_v59 = vld [vmem:[%s2521_s6 + $0x38] sm:$0xff]  ;;  %v1648_v62 = vld [vmem:[%s2521_s6 + $0x20] sm:$0xff]  ;;  %v1670_v2 = vld [vmem:[%s2517_s2 + $0x48] sm:$0xff] }
  0x3c   : > { %1593 = vmatmul.msk.f32.gmra.mxu0 %vm420_vm0, %v393_v22  ;;  %v704_v6 = vld [vmem:[%s2522_s7 + $0x8] sm:$0xff]  ;;  %v753_v43 = vld [vmem:[%s2523_s8] sm:$0x1] }
  0x3d   : > { %1597 = vmatmul.msk.f32.gmra.mxu1 %vm420_vm0, %v393_v22  ;;  %514 = vperm.xlu0 %1762, %v504_v23  }
  0x3e   : > { %509 = vperm.xlu1 %1763, %v503_v24   ;;  %519 = vperm.xlu2 %1764, %v505_v46  }
  0x44   : > { %1594 = vmatmul.msk.f32.gmra.mxu0 %vm420_vm0, %v394_v25 }
  0x45   : > { %1598 = vmatmul.msk.f32.gmra.mxu1 %vm420_vm0, %v394_v25  ;;  %625 = vperm.xlu0 %1762, %v611_v26  }
  0x46   : > { %620 = vperm.xlu1 %1763, %v610_v27   ;;  %630 = vperm.xlu2 %1764, %v612_v49  }
  0x4c   : > { %1595 = vmatmul.msk.f32.gmra.mxu0 %vm420_vm0, %v395_v28 }
  0x4d   : > { %1599 = vmatmul.msk.f32.gmra.mxu1 %vm420_vm0, %v395_v28  ;;  %799 = vperm.xlu0 %1762, %v1623_v29  }
  0x4e   : > { %794 = vperm.xlu1 %1763, %v1622_v30   ;;  %615 = vperm.xlu2 %1764, %v609_v52  }
  0x55   : > { %784 = vperm.xlu0 %1762, %v1620_v31   ;;  %v705_v31 = vld [vmem:[%s2522_s7 + $0x10] sm:$0xff] }
  0x56   : > { %907 = vperm.xlu1 %1763, %v1639_v32   ;;  %789 = vperm.xlu2 %1764, %v1621_v55  }
  0x5d   : > { %897 = vperm.xlu0 %1762, %v1637_v33  }
  0x5e   : > { %892 = vperm.xlu1 %1763, %v1636_v34   ;;  %902 = vperm.xlu2 %1764, %v1638_v58  }
  0x65   : > { %1010 = vperm.xlu0 %1762, %v1650_v35  }
  0x66   : > { %1005 = vperm.xlu1 %1763, %v1649_v36   ;;  %1015 = vperm.xlu2 %1764, %v1651_v59   ;;  %v499_v36 = vld [vmem:[%s2518_s3] sm:$0xff] }
  0x6d   : > { %1186 = vperm.xlu0 %1762, %v1672_v37   ;;  %v1687_v37 = vld [vmem:[%s2519_s4 + $0x50] sm:$0xff] }
  0x6e   : > { %1181 = vperm.xlu1 %1763, %v1671_v38   ;;  %1000 = vperm.xlu2 %1764, %v1648_v62   ;;  %v500_v38 = vld [vmem:[%s2518_s3 + $0x8] sm:$0xff] }
  0x75   : > { %1171 = vperm.xlu0 %1762, %v1669_v39   ;;  %v1688_v39 = vld [vmem:[%s2519_s4 + $0x58] sm:$0xff] }
  0x76   : > { %709 = vperm.xlu1 %1763, %v703_v40   ;;  %1176 = vperm.xlu2 %1764, %v1670_v2   ;;  %v501_v40 = vld [vmem:[%s2518_s3 + $0x10] sm:$0xff] }
  0x7d   : > { %1279 = vperm.xlu0 %1762, %v1685_v41   ;;  %v1663_v41 = vld [vmem:[%s2522_s7 + $0x38] sm:$0xff] }
  0x7e   : > { %1284 = vperm.xlu1 %1763, %v1686_v42   ;;  %714 = vperm.xlu2 %1764, %v704_v6   ;;  %v502_v42 = vld [vmem:[%s2518_s3 + $0x18] sm:$0xff] }
  0x85   : > { %1095 = vperm.xlu0 %1762, %v1660_v44  }
  0x86   : > { %1100 = vperm.xlu1 %1763, %v1661_v45   ;;  %719 = vperm.xlu2 %1764, %v705_v31  }
  0x8d   : > { %724 = vperm.xlu0 %1762, %v706_v47  }
  0x8e   : > { %1105 = vperm.xlu1 %1763, %v1662_v48   ;;  %1289 = vperm.xlu2 %1764, %v1687_v37  }
  0x90   : > { %v525_v44 = vpop.permute.xlu2 %524 }
  0x95   : > { %1382 = vperm.xlu0 %1762, %v1697_v50  }
  0x96   : > { %1387 = vperm.xlu1 %1763, %v1698_v51   ;;  %1294 = vperm.xlu2 %1764, %v1688_v39  }
  0x98   : > { %v520_v46 = vpop.permute.xlu2 %519 }
  0x9d   : > { %1392 = vperm.xlu0 %1762, %v1699_v53  }
  0x9e   : > { %1397 = vperm.xlu1 %1763, %v1700_v54   ;;  %v418_v1 = vpop.permute.xlu0 %417  ;;  %1110 = vperm.xlu2 %1764, %v1663_v41  }
  0x9f   : > { %v408_v5 = vpop.permute.xlu1 %407 }
  0xa0   : > { %v2217_v48 = vpop.permute.xlu2 %630 }
  0xa5   : > { %1143 = vperm.xlu0 %1762, %v1664_v56  }
  0xa6   : > { %1430 = vperm.xlu1 %1763, %v1701_v57   ;;  %756 = vperm.xlu2 %1764, %v753_v43  }
  0xa7   : > { %v413_v7 = vpop.permute.xlu0 %412 }
  0xa8   : > { %v403_v26 = vpop.permute.xlu1 %402  ;;  %v2221_v51 = vpop.permute.xlu2 %615 }
  0xaf   : > { %v515_v45 = vpop.permute.xlu0 %514 }
  0xb0   : > { %v510_v49 = vpop.permute.xlu1 %509  ;;  %v2227_v54 = vpop.permute.xlu2 %789 }
  0xb1   : > { %v450_v60 = vpop.f32.mrf.mxu0 }
  0xb2   : > { %v479_v61 = vpop.f32.mrf.mxu1  ;;  %v451_v27 = vadd.f32 %v450_v60, %v403_v26 }
  0xb3   : > { %v480_v28 = vadd.f32 %v479_v61, %v403_v26 }
  0xb4   : > { %v491_v34 = vmax.f32 %v451_v27, 0.0 }
  0xb5   : > { %v492_v35 = vmax.f32 %v480_v28, 0.0 }
  0xb7   : > { %v2215_v47 = vpop.permute.xlu0 %625 }
  0xb8   : > { %v2223_v52 = vpop.permute.xlu1 %620  ;;  %v2233_v57 = vpop.permute.xlu2 %902 }
  0xb9   : > { %v453_v63 = vpop.f32.mrf.mxu0 }
  0xba   : > { %v482_v0 = vpop.f32.mrf.mxu1  ;;  %v454_v22 = vadd.f32 %v453_v63, %v408_v5 }
  0xbb   : > { %v483_v23 = vadd.f32 %v482_v0, %v408_v5 }
  0xbc   : > { %v493_v32 = vmax.f32 %v454_v22, 0.0 }
  0xbd   : > { %v494_v33 = vmax.f32 %v483_v23, 0.0 }
  0xbf   : > { %v2219_v50 = vpop.permute.xlu0 %799 }
  0xc0   : > { %v2229_v55 = vpop.permute.xlu1 %794  ;;  %v2239_v60 = vpop.permute.xlu2 %1015 }
  0xc1   : > { %v456_v3 = vpop.f32.mrf.mxu0 }
  0xc2   : > { %v485_v4 = vpop.f32.mrf.mxu1  ;;  %v457_v10 = vadd.f32 %v456_v3, %v413_v7 }
  0xc3   : > { %v486_v19 = vadd.f32 %v485_v4, %v413_v7 }
  0xc4   : > { %v495_v29 = vmax.f32 %v457_v10, 0.0 }
  0xc5   : > { %v496_v30 = vmax.f32 %v486_v19, 0.0 }
  0xc7   : > { %v2225_v53 = vpop.permute.xlu0 %784 }
  0xc8   : > { %v2235_v58 = vpop.permute.xlu1 %907  ;;  %v2245_v63 = vpop.permute.xlu2 %1000 }
  0xc9   : > { %v459_v8 = vpop.f32.mrf.mxu0 }
  0xca   : > { %v488_v9 = vpop.f32.mrf.mxu1  ;;  %v460_v20 = vadd.f32 %v459_v8, %v418_v1 }
  0xcb   : > { %v489_v21 = vadd.f32 %v488_v9, %v418_v1 }
  0xcc   : > { %v497_v24 = vmax.f32 %v460_v20, 0.0 }
  0xcd   : > { %v498_v25 = vmax.f32 %v489_v21, 0.0 }
  0xce   : > { %551 = vmatpush.msra.mxu2 %v497_v24 }
  0xcf   : > { %580 = vmatpush.msra.mxu3 %v498_v25  ;;  %v2231_v56 = vpop.permute.xlu0 %897 }
  0xd0   : > { %552 = vmatpush.msra.mxu2 %v495_v29  ;;  %v2241_v61 = vpop.permute.xlu1 %892  ;;  %v2251_v2 = vpop.permute.xlu2 %1176 }
  0xd1   : > { %581 = vmatpush.msra.mxu3 %v496_v30 }
  0xd2   : > { %553 = vmatpush.msra.mxu2 %v493_v32 }
  0xd3   : > { %582 = vmatpush.msra.mxu3 %v494_v33 }
  0xd4   : > { %554 = vmatpush.msra.mxu2 %v491_v34 }
  0xd5   : > { %583 = vmatpush.msra.mxu3 %v492_v35  ;;  %1600 = vmatmul.msk.f32.vlgmr.msra.gmra.mxu2 %vm420_vm0, %v499_v36 }
  0xd6   : > { %1604 = vmatmul.msk.f32.vlgmr.msra.gmra.mxu3 %vm420_vm0, %v499_v36 }
  0xd7   : > { %v2237_v59 = vpop.permute.xlu0 %1010 }
  0xd8   : > { %v2247_v0 = vpop.permute.xlu1 %1005  ;;  %v715_v23 = vpop.permute.xlu2 %714 }
  0xdd   : > { %1601 = vmatmul.msk.f32.gmra.mxu2 %vm420_vm0, %v500_v38 }
  0xde   : > { %1605 = vmatmul.msk.f32.gmra.mxu3 %vm420_vm0, %v500_v38 }
  0xdf   : > { %v2243_v62 = vpop.permute.xlu0 %1186 }
  0xe0   : > { %v2253_v5 = vpop.permute.xlu1 %1181 }
  0xe5   : > { %1602 = vmatmul.msk.f32.gmra.mxu2 %vm420_vm0, %v501_v40 }
  0xe6   : > { %1606 = vmatmul.msk.f32.gmra.mxu3 %vm420_vm0, %v501_v40  ;;  %v720_v40 = vpop.permute.xlu2 %719 }
  0xe7   : > { %v2249_v1 = vpop.permute.xlu0 %1171 }
  0xe8   : > { %v710_v26 = vpop.permute.xlu1 %709 }
  0xed   : > { %1603 = vmatmul.msk.f32.gmra.mxu2 %vm420_vm0, %v502_v42 }
  0xee   : > { %1607 = vmatmul.msk.f32.gmra.mxu3 %vm420_vm0, %v502_v42 }
  0xef   : > { %v2255_v8 = vpop.permute.xlu0 %1279 }
  0xf7   : > { %v2257_v37 = vpop.permute.xlu0 %1095 }
 0x158   : > { %v556_v3 = vpop.f32.mrf.mxu2 }
 0x159   : > { %v585_v4 = vpop.f32.mrf.mxu3  ;;  %v557_v6 = vadd.f32 %v556_v3, %v510_v49 }
 0x15a   : > { %v586_v7 = vadd.f32 %v585_v4, %v510_v49 }
 0x15b   : > { %v597_v19 = vmax.f32 %v557_v6, 0.0 }
 0x15c   : > { %v598_v20 = vmax.f32 %v586_v7, 0.0 }
 0x15d   : > { %v727_v27 = vmul.f32 %v710_v26, %v597_v19 }
 0x15e   : > { %v728_v28 = vmul.f32 %v710_v26, %v598_v20  ;;  %v605_v26 = vld [vmem:[#allocation3] sm:$0xff] }
 0x160   : > { %v559_v9 = vpop.f32.mrf.mxu2 }
 0x161   : > { %v588_v10 = vpop.f32.mrf.mxu3  ;;  %v560_v21 = vadd.f32 %v559_v9, %v515_v45 }
 0x162   : > { %v589_v22 = vadd.f32 %v588_v10, %v515_v45  ;;  %v725_v10 = vpop.permute.xlu0 %724 }
 0x163   : > { %v599_v24 = vmax.f32 %v560_v21, 0.0 }
 0x164   : > { %v600_v25 = vmax.f32 %v589_v22, 0.0 }
 0x165   : > { %v729_v29 = vmul.f32 %v715_v23, %v599_v24 }
 0x166   : > { %v730_v30 = vmul.f32 %v715_v23, %v600_v25 }
 0x167   : > { %v735_v31 = vadd.f32 %v729_v29, %v727_v27  ;;  %v607_v27 = vld [vmem:[#allocation3 + $0x10] sm:$0xff] }
 0x168   : > { %v744_v32 = vadd.f32 %v730_v30, %v728_v28  ;;  %v562_v33 = vpop.f32.mrf.mxu2  ;;  %v608_v28 = vld [vmem:[#allocation3 + $0x18] sm:$0xff] }
 0x169   : > { %v591_v34 = vpop.f32.mrf.mxu3  ;;  %v563_v35 = vadd.f32 %v562_v33, %v520_v46 }
 0x16a   : > { %v592_v36 = vadd.f32 %v591_v34, %v520_v46 }
 0x16b   : > { %v601_v38 = vmax.f32 %v563_v35, 0.0 }
 0x16c   : > { %v602_v39 = vmax.f32 %v592_v36, 0.0 }
 0x16d   : > { %v731_v41 = vmul.f32 %v720_v40, %v601_v38 }
 0x16e   : > { %v732_v42 = vmul.f32 %v720_v40, %v602_v39 }
 0x16f   : > { %v736_v43 = vadd.f32 %v735_v31, %v731_v41 }
 0x170   : > { %v745_v45 = vadd.f32 %v744_v32, %v732_v42  ;;  %v565_v49 = vpop.f32.mrf.mxu2 }
 0x171   : > { %v594_v3 = vpop.f32.mrf.mxu3  ;;  %v566_v4 = vadd.f32 %v565_v49, %v525_v44 }
 0x172   : > { %v595_v6 = vadd.f32 %v594_v3, %v525_v44  ;;  %v606_v44 = vld [vmem:[#allocation3 + $0x8] sm:$0xff] }
 0x173   : > { %v603_v7 = vmax.f32 %v566_v4, 0.0 }
 0x174   : > { %v604_v9 = vmax.f32 %v595_v6, 0.0 }
 0x175   : > { %v733_v21 = vmul.f32 %v725_v10, %v603_v7  ;;  %657 = vmatpush.msrb.mxu0 %v603_v7 }
 0x176   : > { %v734_v22 = vmul.f32 %v725_v10, %v604_v9  ;;  %686 = vmatpush.msrb.mxu1 %v604_v9 }
 0x177   : > { %v2259_v46 = vadd.f32 %v736_v43, %v733_v21  ;;  %658 = vmatpush.msrb.mxu0 %v601_v38 }
 0x178   : > { %v2261_v23 = vadd.f32 %v745_v45, %v734_v22  ;;  %687 = vmatpush.msrb.mxu1 %v602_v39 }
 0x179   : > { %659 = vmatpush.msrb.mxu0 %v599_v24 }
 0x17a   : > { %688 = vmatpush.msrb.mxu1 %v600_v25 }
 0x17b   : > { %660 = vmatpush.msrb.mxu0 %v597_v19 }
 0x17c   : > { %689 = vmatpush.msrb.mxu1 %v598_v20  ;;  %1608 = vmatmul.msk.f32.vlgmr.msrb.gmra.mxu0 %vm420_vm0, %v605_v26 }
 0x17d   : > { %1612 = vmatmul.msk.f32.vlgmr.msrb.gmra.mxu1 %vm420_vm0, %v605_v26 }
 0x184   : > { %1609 = vmatmul.msk.f32.gmra.mxu0 %vm420_vm0, %v606_v44 }
 0x185   : > { %1613 = vmatmul.msk.f32.gmra.mxu1 %vm420_vm0, %v606_v44 }
 0x18c   : > { %1610 = vmatmul.msk.f32.gmra.mxu0 %vm420_vm0, %v607_v27 }
 0x18d   : > { %1614 = vmatmul.msk.f32.gmra.mxu1 %vm420_vm0, %v607_v27 }
 0x194   : > { %1611 = vmatmul.msk.f32.gmra.mxu0 %vm420_vm0, %v608_v28 }
 0x195   : > { %1615 = vmatmul.msk.f32.gmra.mxu1 %vm420_vm0, %v608_v28 }
 0x1f9   : > { %v662_v19 = vpop.f32.mrf.mxu0 }
 0x1fa   : > { %v691_v20 = vpop.f32.mrf.mxu1  ;;  %v663_v42 = vadd.f32 %v662_v19, %v2221_v51 }
 0x1fb   : > { %v692_v43 = vadd.f32 %v691_v20, %v2221_v51  ;;  %v1616_v51 = vld [vmem:[%s2516_s1 + $0x20] sm:$0xff] }
 0x201   : > { %v665_v24 = vpop.f32.mrf.mxu0 }
 0x202   : > { %v694_v25 = vpop.f32.mrf.mxu1  ;;  %v666_v38 = vadd.f32 %v665_v24, %v2223_v52 }
 0x203   : > { %v695_v39 = vadd.f32 %v694_v25, %v2223_v52 }
 0x204   : > { %v2296_v52 = vsub.f32 %v2026_v15, %v666_v38  ;;  %v1617_v15 = vld [vmem:[%s2516_s1 + $0x28] sm:$0xff] }
 0x205   : > { %v2299_v45 = vsub.f32 %v2028_v16, %v695_v39  ;;  %v1618_v16 = vld [vmem:[%s2516_s1 + $0x30] sm:$0xff]  ;;  %v2361_v39 = vpop.permute.xlu2 %1289 }
 0x209   : > { %v668_v29 = vpop.f32.mrf.mxu0 }
 0x20a   : > { %v697_v30 = vpop.f32.mrf.mxu1  ;;  %v669_v33 = vadd.f32 %v668_v29, %v2215_v47 }
 0x20b   : > { %v698_v34 = vadd.f32 %v697_v30, %v2215_v47 }
 0x20c   : > { %v2288_v47 = vsub.f32 %v2020_v13, %v669_v33  ;;  %v2304_v13 = vsub.f32 %v2032_v17, %v663_v42  ;;  %v1619_v17 = vld [vmem:[%s2516_s1 + $0x38] sm:$0xff]  ;;  %v1634_v33 = vld [vmem:[%s2518_s3 + $0x30] sm:$0xff] }
 0x211   : > { %v671_v31 = vpop.f32.mrf.mxu0 }
 0x212   : > { %v700_v32 = vpop.f32.mrf.mxu1  ;;  %v672_v35 = vadd.f32 %v671_v31, %v2217_v48 }
 0x213   : > { %v701_v36 = vadd.f32 %v700_v32, %v2217_v48  ;;  %v2291_v48 = vsub.f32 %v2022_v14, %v698_v34  ;;  %v2307_v14 = vsub.f32 %v2034_v18, %v692_v43  ;;  %v1635_v34 = vld [vmem:[%s2518_s3 + $0x38] sm:$0xff] }
 0x214   : > { %v2278_v40 = vsub.f32 %v2016_v11, %v672_v35  ;;  %v2359_v35 = vpop.permute.xlu1 %1284 }
 0x215   : > { %v2281_v41 = vsub.f32 %v2018_v12, %v701_v36 }
 0x216   : > { %826 = vmatpush.msrb.mxu2 %v2278_v40 }
 0x217   : > { %855 = vmatpush.msrb.mxu3 %v2281_v41 }
 0x218   : > { %827 = vmatpush.msrb.mxu2 %v2288_v47 }
 0x219   : > { %856 = vmatpush.msrb.mxu3 %v2291_v48 }
 0x21a   : > { %828 = vmatpush.msrb.mxu2 %v2296_v52 }
 0x21b   : > { %857 = vmatpush.msrb.mxu3 %v2299_v45 }
 0x21c   : > { %829 = vmatpush.msrb.mxu2 %v2304_v13 }
 0x21d   : > { %858 = vmatpush.msrb.mxu3 %v2307_v14  ;;  %1624 = vmatmul.msk.f32.vlgmr.msrb.gmra.mxu2 %vm420_vm0, %v1616_v51 }
 0x21e   : > { %1628 = vmatmul.msk.f32.vlgmr.msrb.gmra.mxu3 %vm420_vm0, %v1616_v51 }
 0x225   : > { %1625 = vmatmul.msk.f32.gmra.mxu2 %vm420_vm0, %v1617_v15 }
 0x226   : > { %1629 = vmatmul.msk.f32.gmra.mxu3 %vm420_vm0, %v1617_v15 }
 0x22d   : > { %1626 = vmatmul.msk.f32.gmra.mxu2 %vm420_vm0, %v1618_v16 }
 0x22e   : > { %1630 = vmatmul.msk.f32.gmra.mxu3 %vm420_vm0, %v1618_v16 }
 0x235   : > { %1627 = vmatmul.msk.f32.gmra.mxu2 %vm420_vm0, %v1619_v17 }
 0x236   : > { %1631 = vmatmul.msk.f32.gmra.mxu3 %vm420_vm0, %v1619_v17 }
 0x2a0   : > { %v831_v18 = vpop.f32.mrf.mxu2 }
 0x2a1   : > { %v860_v49 = vpop.f32.mrf.mxu3  ;;  %v832_v24 = vadd.f32 %v831_v18, %v2225_v53 }
 0x2a2   : > { %v861_v25 = vadd.f32 %v860_v49, %v2225_v53  ;;  %v1633_v53 = vld [vmem:[%s2518_s3 + $0x28] sm:$0xff] }
 0x2a3   : > { %v872_v32 = vmax.f32 %v832_v24, 0.0 }
 0x2a8   : > { %v834_v3 = vpop.f32.mrf.mxu2 }
 0x2a9   : > { %v863_v4 = vpop.f32.mrf.mxu3  ;;  %v835_v27 = vadd.f32 %v834_v3, %v2227_v54  ;;  %v1101_v3 = vpop.permute.xlu1 %1100 }
 0x2aa   : > { %v864_v28 = vadd.f32 %v863_v4, %v2227_v54  ;;  %v1632_v54 = vld [vmem:[%s2518_s3 + $0x20] sm:$0xff] }
 0x2ab   : > { %v874_v31 = vmax.f32 %v835_v27, 0.0 }
 0x2b0   : > { %v837_v6 = vpop.f32.mrf.mxu2 }
 0x2b1   : > { %v866_v7 = vpop.f32.mrf.mxu3  ;;  %v838_v21 = vadd.f32 %v837_v6, %v2229_v55 }
 0x2b2   : > { %v867_v22 = vadd.f32 %v866_v7, %v2229_v55  ;;  %v875_v55 = vmax.f32 %v864_v28, 0.0 }
 0x2b3   : > { %v876_v29 = vmax.f32 %v838_v21, 0.0  ;;  %v2375_v21 = vpop.permute.xlu2 %1294 }
 0x2b4   : > { %v877_v30 = vmax.f32 %v867_v22, 0.0 }
 0x2b8   : > { %v840_v9 = vpop.f32.mrf.mxu2 }
 0x2b9   : > { %v869_v10 = vpop.f32.mrf.mxu3  ;;  %v841_v26 = vadd.f32 %v840_v9, %v2219_v50 }
 0x2ba   : > { %v870_v44 = vadd.f32 %v869_v10, %v2219_v50  ;;  %v873_v50 = vmax.f32 %v861_v25, 0.0 }
 0x2bb   : > { %v878_v19 = vmax.f32 %v841_v26, 0.0 }
 0x2bc   : > { %v879_v20 = vmax.f32 %v870_v44, 0.0  ;;  %v738_v44 = vrot.slane %v2259_v46, 4 }
 0x2bd   : > { %934 = vmatpush.msra.mxu0 %v878_v19  ;;  %v747_v19 = vrot.slane %v2261_v23, 4 }
 0x2be   : > { %963 = vmatpush.msra.mxu1 %v879_v20 }
 0x2bf   : > { %935 = vmatpush.msra.mxu0 %v876_v29  ;;  %v1106_v29 = vpop.permute.xlu1 %1105 }
 0x2c0   : > { %964 = vmatpush.msra.mxu1 %v877_v30  ;;  %v739_v30 = vadd.f32 %v738_v44, %v2259_v46 }
 0x2c1   : > { %936 = vmatpush.msra.mxu0 %v874_v31  ;;  %v748_v31 = vadd.f32 %v747_v19, %v2261_v23 }
 0x2c2   : > { %965 = vmatpush.msra.mxu1 %v875_v55 }
 0x2c3   : > { %937 = vmatpush.msra.mxu0 %v872_v32 }
 0x2c4   : > { %966 = vmatpush.msra.mxu1 %v873_v50  ;;  %1640 = vmatmul.msk.f32.vlgmr.msra.gmra.mxu0 %vm420_vm0, %v1632_v54 }
 0x2c5   : > { %1644 = vmatmul.msk.f32.vlgmr.msra.gmra.mxu1 %vm420_vm0, %v1632_v54 }
 0x2cc   : > { %1641 = vmatmul.msk.f32.gmra.mxu0 %vm420_vm0, %v1633_v53 }
 0x2cd   : > { %1645 = vmatmul.msk.f32.gmra.mxu1 %vm420_vm0, %v1633_v53  ;;  %v740_v53 = vrot.slane %v739_v30, 2 }
 0x2d4   : > { %1642 = vmatmul.msk.f32.gmra.mxu0 %vm420_vm0, %v1634_v33 }
 0x2d5   : > { %1646 = vmatmul.msk.f32.gmra.mxu1 %vm420_vm0, %v1634_v33 }
 0x2dc   : > { %1643 = vmatmul.msk.f32.gmra.mxu0 %vm420_vm0, %v1635_v34 }
 0x2dd   : > { %1647 = vmatmul.msk.f32.gmra.mxu1 %vm420_vm0, %v1635_v34 }
 0x341   : > { %v939_v36 = vpop.f32.mrf.mxu0 }
 0x342   : > { %v968_v38 = vpop.f32.mrf.mxu1  ;;  %v2364_v42 = vadd.f32 %v939_v36, %v2241_v61  ;;  %v749_v36 = vrot.slane %v748_v31, 2 }
 0x343   : > { %v2367_v43 = vadd.f32 %v968_v38, %v2241_v61 }
 0x344   : > { %v980_v16 = vmax.f32 %v2364_v42, 0.0  ;;  %v1111_v42 = vpop.permute.xlu2 %1110 }
 0x345   : > { %v981_v17 = vmax.f32 %v2367_v43, 0.0 }
 0x346   : > { %v1113_v7 = vmul.f32 %v2257_v37, %v980_v16 }
 0x347   : > { %v1114_v9 = vmul.f32 %v2257_v37, %v981_v17  ;;  %v2381_v37 = vpop.permute.xlu0 %1382 }
 0x349   : > { %v942_v51 = vpop.f32.mrf.mxu0 }
 0x34a   : > { %v971_v15 = vpop.f32.mrf.mxu1  ;;  %v943_v18 = vadd.f32 %v942_v51, %v2231_v56 }
 0x34b   : > { %v972_v49 = vadd.f32 %v971_v15, %v2231_v56  ;;  %v741_v15 = vadd.f32 %v740_v53, %v739_v30 }
 0x34c   : > { %v982_v4 = vmax.f32 %v943_v18, 0.0  ;;  %v750_v18 = vadd.f32 %v749_v36, %v748_v31 }
 0x34d   : > { %v983_v6 = vmax.f32 %v972_v49, 0.0 }
 0x34e   : > { %v1115_v10 = vmul.f32 %v1101_v3, %v982_v4 }
 0x34f   : > { %v1116_v61 = vmul.f32 %v1101_v3, %v983_v6  ;;  %v2387_v23 = vpop.permute.xlu0 %1392 }
 0x350   : > { %v1121_v22 = vadd.f32 %v1115_v10, %v1113_v7  ;;  %v751_v10 = vrot.slane %v750_v18, 1 }
 0x351   : > { %v1130_v26 = vadd.f32 %v1116_v61, %v1114_v9  ;;  %v945_v27 = vpop.f32.mrf.mxu0  ;;  %v742_v9 = vrot.slane %v741_v15, 1 }
 0x352   : > { %v974_v28 = vpop.f32.mrf.mxu1  ;;  %v946_v56 = vadd.f32 %v945_v27, %v2233_v57  ;;  %v757_v27 = vpop.permute.xlu2 %756  ;;  %v752_v19 = vadd.f32 %v751_v10, %v750_v18 }
 0x353   : > { %v975_v20 = vadd.f32 %v974_v28, %v2233_v57  ;;  %v743_v28 = vadd.f32 %v742_v9, %v741_v15 }
 0x354   : > { %v984_v24 = vmax.f32 %v946_v56, 0.0 }
 0x355   : > { %v985_v25 = vmax.f32 %v975_v20, 0.0 }
 0x356   : > { %v1117_v55 = vmul.f32 %v1106_v29, %v984_v24 }
 0x357   : > { %v1118_v32 = vmul.f32 %v1106_v29, %v985_v25  ;;  %v1144_v30 = vpop.permute.xlu0 %1143 }
 0x358   : > { %v1122_v50 = vadd.f32 %v1121_v22, %v1117_v55 }
 0x359   : > { %v1131_v54 = vadd.f32 %v1130_v26, %v1118_v32  ;;  %v948_v33 = vpop.f32.mrf.mxu0  ;;  %v990_v32 = vld [vmem:[#allocation3 + $0x28] sm:$0xff] }
 0x35a   : > { %v977_v34 = vpop.f32.mrf.mxu1  ;;  %v949_v38 = vadd.f32 %v948_v33, %v2235_v58 }
 0x35b   : > { %v978_v57 = vadd.f32 %v977_v34, %v2235_v58  ;;  %v989_v58 = vld [vmem:[#allocation3 + $0x20] sm:$0xff] }
 0x35c   : > { %v986_v43 = vmax.f32 %v949_v38, 0.0 }
 0x35d   : > { %v987_v51 = vmax.f32 %v978_v57, 0.0  ;;  %v991_v57 = vld [vmem:[#allocation3 + $0x30] sm:$0xff] }
 0x35e   : > { %v1119_v46 = vmul.f32 %v1111_v42, %v986_v43  ;;  %1042 = vmatpush.msra.mxu2 %v986_v43 }
 0x35f   : > { %v1120_v49 = vmul.f32 %v1111_v42, %v987_v51  ;;  %1071 = vmatpush.msra.mxu3 %v987_v51  ;;  %v992_v42 = vld [vmem:[#allocation3 + $0x38] sm:$0xff] }
 0x360   : > { %v1123_v3 = vadd.f32 %v1122_v50, %v1119_v46  ;;  %1043 = vmatpush.msra.mxu2 %v984_v24  ;;  %v759_v24 = vperm.slane %v757_v27, 0 }
 0x361   : > { %v1132_v7 = vadd.f32 %v1131_v54, %v1120_v49  ;;  %1072 = vmatpush.msra.mxu3 %v985_v25 }
 0x362   : > { %v1124_v61 = vrot.slane %v1123_v3, 4  ;;  %1044 = vmatpush.msra.mxu2 %v982_v4  ;;  %v760_v4 = vadd.f32 %v759_v24, %v743_v28 }
 0x363   : > { %v1133_v22 = vrot.slane %v1132_v7, 4  ;;  %1073 = vmatpush.msra.mxu3 %v983_v6  ;;  %v761_v6 = vadd.f32 %v759_v24, %v752_v19 }
 0x364   : > { %v1125_v26 = vadd.f32 %v1124_v61, %v1123_v3  ;;  %1045 = vmatpush.msra.mxu2 %v980_v16  ;;  %v1146_v16 = vperm.slane %v1144_v30, 0  ;;  %v770_v54 = vadd.f32 %v760_v4, %v2016_v11 }
 0x365   : > { %v1134_v44 = vadd.f32 %v1133_v22, %v1132_v7  ;;  %1074 = vmatpush.msra.mxu3 %v981_v17  ;;  %1652 = vmatmul.msk.f32.vlgmr.msra.gmra.mxu2 %vm420_vm0, %v989_v58  ;;  %v771_v53 = vadd.f32 %v761_v6, %v2018_v12 }
 0x366   : > { %1656 = vmatmul.msk.f32.vlgmr.msra.gmra.mxu3 %vm420_vm0, %v989_v58  ;;  %v1126_v56 = vrot.slane %v1125_v26, 2 }
 0x367   : > { %v1135_v20 = vrot.slane %v1134_v44, 2 }
 0x368   : > { %v1127_v25 = vadd.f32 %v1126_v56, %v1125_v26 }
 0x369   : > { %v1136_v29 = vadd.f32 %v1135_v20, %v1134_v44 }
 0x36a   : > { %v1128_v31 = vrot.slane %v1127_v25, 1 }
 0x36b   : > { %v1137_v55 = vrot.slane %v1136_v29, 1 }
 0x36c   : > { %v1129_v17 = vadd.f32 %v1128_v31, %v1127_v25 }
 0x36d   : > { %v1138_v50 = vadd.f32 %v1137_v55, %v1136_v29  ;;  %1653 = vmatmul.msk.f32.gmra.mxu2 %vm420_vm0, %v990_v32 }
 0x36e   : > { %1657 = vmatmul.msk.f32.gmra.mxu3 %vm420_vm0, %v990_v32  ;;  %v1147_v33 = vadd.f32 %v1146_v16, %v1129_v17 }
 0x36f   : > { %v1148_v34 = vadd.f32 %v1146_v16, %v1138_v50 }
 0x370   : > { %v2395_v36 = vadd.f32 %v1147_v33, %v770_v54 }
 0x371   : > { %v2397_v38 = vadd.f32 %v1148_v34, %v771_v53 }
 0x375   : > { %1654 = vmatmul.msk.f32.gmra.mxu2 %vm420_vm0, %v991_v57 }
 0x376   : > { %1658 = vmatmul.msk.f32.gmra.mxu3 %vm420_vm0, %v991_v57  ;;  %v1683_v57 = vld [vmem:[%s2518_s3 + $0x50] sm:$0xff] }
 0x37d   : > { %1655 = vmatmul.msk.f32.gmra.mxu2 %vm420_vm0, %v992_v42 }
 0x37e   : > { %1659 = vmatmul.msk.f32.gmra.mxu3 %vm420_vm0, %v992_v42  ;;  %v1684_v42 = vld [vmem:[%s2518_s3 + $0x58] sm:$0xff] }
 0x3e8   : > { %v1047_v43 = vpop.f32.mrf.mxu2 }
 0x3e9   : > { %v1076_v11 = vpop.f32.mrf.mxu3  ;;  %v1048_v44 = vadd.f32 %v1047_v43, %v2245_v63 }
 0x3ea   : > { %v1077_v27 = vadd.f32 %v1076_v11, %v2245_v63  ;;  %v1665_v63 = vld [vmem:[%s2516_s1 + $0x40] sm:$0xff] }
 0x3f0   : > { %v1050_v51 = vpop.f32.mrf.mxu2 }
 0x3f1   : > { %v1079_v12 = vpop.f32.mrf.mxu3  ;;  %v1051_v61 = vadd.f32 %v1050_v51, %v2247_v0 }
 0x3f2   : > { %v1080_v22 = vadd.f32 %v1079_v12, %v2247_v0  ;;  %v1149_v0 = vsub.f32 %v2304_v13, %v1048_v44 }
 0x3f4   : > { %v1152_v19 = vsub.f32 %v2299_v45, %v1080_v22 }
 0x3f8   : > { %v1053_v15 = vpop.f32.mrf.mxu2 }
 0x3f9   : > { %v1082_v18 = vpop.f32.mrf.mxu3  ;;  %v1054_v3 = vadd.f32 %v1053_v15, %v2237_v59 }
 0x3fa   : > { %v1083_v7 = vadd.f32 %v1082_v18, %v2237_v59 }
 0x3fb   : > { %v1153_v28 = vsub.f32 %v2288_v47, %v1054_v3  ;;  %v1667_v47 = vld [vmem:[%s2516_s1 + $0x50] sm:$0xff] }
 0x3fc   : > { %v1154_v59 = vsub.f32 %v2291_v48, %v1083_v7  ;;  %v1668_v48 = vld [vmem:[%s2516_s1 + $0x58] sm:$0xff] }
 0x400   : > { %v1056_v46 = vpop.f32.mrf.mxu2 }
 0x401   : > { %v1085_v49 = vpop.f32.mrf.mxu3  ;;  %v1057_v9 = vadd.f32 %v1056_v46, %v2239_v60 }
 0x402   : > { %v1086_v10 = vadd.f32 %v1085_v49, %v2239_v60  ;;  %v1151_v60 = vsub.f32 %v2296_v52, %v1051_v61  ;;  %v1388_v61 = vpop.permute.xlu1 %1387 }
 0x403   : > { %v1155_v58 = vsub.f32 %v2278_v40, %v1057_v9  ;;  %v1150_v40 = vsub.f32 %v2307_v14, %v1077_v27 }
 0x404   : > { %v1156_v26 = vsub.f32 %v2281_v41, %v1086_v10  ;;  %v1666_v41 = vld [vmem:[%s2516_s1 + $0x48] sm:$0xff] }
 0x405   : > { %1213 = vmatpush.msrb.mxu0 %v1155_v58 }
 0x406   : > { %1242 = vmatpush.msrb.mxu1 %v1156_v26 }
 0x407   : > { %1214 = vmatpush.msrb.mxu0 %v1153_v28 }
 0x408   : > { %1243 = vmatpush.msrb.mxu1 %v1154_v59 }
 0x409   : > { %1215 = vmatpush.msrb.mxu0 %v1151_v60 }
 0x40a   : > { %1244 = vmatpush.msrb.mxu1 %v1152_v19 }
 0x40b   : > { %1216 = vmatpush.msrb.mxu0 %v1149_v0 }
 0x40c   : > { %1245 = vmatpush.msrb.mxu1 %v1150_v40  ;;  %1673 = vmatmul.msk.f32.vlgmr.msrb.gmra.mxu0 %vm420_vm0, %v1665_v63 }
 0x40d   : > { %1677 = vmatmul.msk.f32.vlgmr.msrb.gmra.mxu1 %vm420_vm0, %v1665_v63 }
 0x414   : > { %1674 = vmatmul.msk.f32.gmra.mxu0 %vm420_vm0, %v1666_v41 }
 0x415   : > { %1678 = vmatmul.msk.f32.gmra.mxu1 %vm420_vm0, %v1666_v41 }
 0x41c   : > { %1675 = vmatmul.msk.f32.gmra.mxu0 %vm420_vm0, %v1667_v47 }
 0x41d   : > { %1679 = vmatmul.msk.f32.gmra.mxu1 %vm420_vm0, %v1667_v47 }
 0x424   : > { %1676 = vmatmul.msk.f32.gmra.mxu0 %vm420_vm0, %v1668_v48 }
 0x425   : > { %1680 = vmatmul.msk.f32.gmra.mxu1 %vm420_vm0, %v1668_v48 }
 0x489   : > { %v1218_v52 = vpop.f32.mrf.mxu0 }
 0x48a   : > { %v1247_v45 = vpop.f32.mrf.mxu1  ;;  %v1219_v17 = vadd.f32 %v1218_v52, %v2249_v1 }
 0x48b   : > { %v1248_v50 = vadd.f32 %v1247_v45, %v2249_v1  ;;  %v1682_v1 = vld [vmem:[%s2518_s3 + $0x48] sm:$0xff] }
 0x48c   : > { %v1259_v34 = vmax.f32 %v1219_v17, 0.0 }
 0x491   : > { %v1221_v13 = vpop.f32.mrf.mxu0 }
 0x492   : > { %v1250_v14 = vpop.f32.mrf.mxu1  ;;  %v1222_v31 = vadd.f32 %v1221_v13, %v2251_v2  ;;  %v1398_v13 = vpop.permute.xlu1 %1397 }
 0x493   : > { %v1251_v55 = vadd.f32 %v1250_v14, %v2251_v2  ;;  %v1681_v2 = vld [vmem:[%s2518_s3 + $0x40] sm:$0xff] }
 0x494   : > { %v1261_v33 = vmax.f32 %v1222_v31, 0.0 }
 0x499   : > { %v1224_v56 = vpop.f32.mrf.mxu0 }
 0x49a   : > { %v1253_v20 = vpop.f32.mrf.mxu1  ;;  %v1225_v29 = vadd.f32 %v1224_v56, %v2253_v5 }
 0x49b   : > { %v1254_v30 = vadd.f32 %v1253_v20, %v2253_v5  ;;  %v1262_v5 = vmax.f32 %v1251_v55, 0.0 }
 0x49c   : > { %v1263_v54 = vmax.f32 %v1225_v29, 0.0 }
 0x49d   : > { %v1264_v53 = vmax.f32 %v1254_v30, 0.0 }
 0x4a1   : > { %v1227_v24 = vpop.f32.mrf.mxu0 }
 0x4a2   : > { %v1256_v25 = vpop.f32.mrf.mxu1  ;;  %v1228_v4 = vadd.f32 %v1227_v24, %v2243_v62 }
 0x4a3   : > { %v1257_v6 = vadd.f32 %v1256_v25, %v2243_v62  ;;  %v1260_v62 = vmax.f32 %v1248_v50, 0.0 }
 0x4a4   : > { %v1265_v32 = vmax.f32 %v1228_v4, 0.0 }
 0x4a5   : > { %v1266_v16 = vmax.f32 %v1257_v6, 0.0 }
 0x4a6   : > { %1321 = vmatpush.msrb.mxu2 %v1265_v32 }
 0x4a7   : > { %1350 = vmatpush.msrb.mxu3 %v1266_v16 }
 0x4a8   : > { %1322 = vmatpush.msrb.mxu2 %v1263_v54 }
 0x4a9   : > { %1351 = vmatpush.msrb.mxu3 %v1264_v53 }
 0x4aa   : > { %1323 = vmatpush.msrb.mxu2 %v1261_v33 }
 0x4ab   : > { %1352 = vmatpush.msrb.mxu3 %v1262_v5 }
 0x4ac   : > { %1324 = vmatpush.msrb.mxu2 %v1259_v34 }
 0x4ad   : > { %1353 = vmatpush.msrb.mxu3 %v1260_v62  ;;  %1689 = vmatmul.msk.f32.vlgmr.msrb.gmra.mxu2 %vm420_vm0, %v1681_v2 }
 0x4ae   : > { %1693 = vmatmul.msk.f32.vlgmr.msrb.gmra.mxu3 %vm420_vm0, %v1681_v2 }
 0x4b5   : > { %1690 = vmatmul.msk.f32.gmra.mxu2 %vm420_vm0, %v1682_v1 }
 0x4b6   : > { %1694 = vmatmul.msk.f32.gmra.mxu3 %vm420_vm0, %v1682_v1 }
 0x4bd   : > { %1691 = vmatmul.msk.f32.gmra.mxu2 %vm420_vm0, %v1683_v57 }
 0x4be   : > { %1695 = vmatmul.msk.f32.gmra.mxu3 %vm420_vm0, %v1683_v57 }
 0x4c5   : > { %1692 = vmatmul.msk.f32.gmra.mxu2 %vm420_vm0, %v1684_v42 }
 0x4c6   : > { %1696 = vmatmul.msk.f32.gmra.mxu3 %vm420_vm0, %v1684_v42 }
 0x530   : > { %v1326_v43 = vpop.f32.mrf.mxu2 }
 0x531   : > { %v1355_v11 = vpop.f32.mrf.mxu3  ;;  %v1327_v46 = vadd.f32 %v1326_v43, %v2255_v8 }
 0x532   : > { %v1356_v49 = vadd.f32 %v1355_v11, %v2255_v8 }
 0x533   : > { %v1367_v26 = vmax.f32 %v1327_v46, 0.0 }
 0x534   : > { %v1368_v44 = vmax.f32 %v1356_v49, 0.0 }
 0x536   : > { %v1401_v19 = vmul.f32 %v2381_v37, %v1368_v44 }
 0x538   : > { %v1329_v51 = vpop.f32.mrf.mxu2 }
 0x539   : > { %v1358_v12 = vpop.f32.mrf.mxu3  ;;  %v1330_v15 = vadd.f32 %v1329_v51, %v2359_v35 }
 0x53a   : > { %v1359_v18 = vadd.f32 %v1358_v12, %v2359_v35  ;;  %v1400_v35 = vmul.f32 %v2381_v37, %v1367_v26 }
 0x53b   : > { %v1369_v22 = vmax.f32 %v1330_v15, 0.0 }
 0x53c   : > { %v1370_v58 = vmax.f32 %v1359_v18, 0.0 }
 0x53d   : > { %v1402_v59 = vmul.f32 %v1388_v61, %v1369_v22 }
 0x53e   : > { %v1403_v60 = vmul.f32 %v1388_v61, %v1370_v58 }
 0x53f   : > { %v1408_v47 = vadd.f32 %v1402_v59, %v1400_v35 }
 0x540   : > { %v1332_v3 = vpop.f32.mrf.mxu2  ;;  %v1417_v48 = vadd.f32 %v1403_v60, %v1401_v19  ;;  %v1483_v60 = vlaneseq }
 0x541   : > { %v1361_v7 = vpop.f32.mrf.mxu3  ;;  %v1333_v9 = vadd.f32 %v1332_v3, %v2361_v39 }
 0x542   : > { %v1362_v10 = vadd.f32 %v1361_v7, %v2361_v39  ;;  %vm1485_vm9 = vcmp.lt.s32.totalorder %v1483_v60, 256 }
 0x543   : > { %v1371_v27 = vmax.f32 %v1333_v9, 0.0 }
 0x544   : > { %v1372_v28 = vmax.f32 %v1362_v10, 0.0 }
 0x545   : > { %v1404_v40 = vmul.f32 %v2387_v23, %v1371_v27 }
 0x546   : > { %v1405_v63 = vmul.f32 %v2387_v23, %v1372_v28 }
 0x547   : > { %v1409_v14 = vadd.f32 %v1408_v47, %v1404_v40 }
 0x548   : > { %v1335_v8 = vpop.f32.mrf.mxu2  ;;  %v1418_v56 = vadd.f32 %v1417_v48, %v1405_v63 }
 0x549   : > { %v1364_v0 = vpop.f32.mrf.mxu3  ;;  %v1336_v39 = vadd.f32 %v1335_v8, %v2375_v21 }
 0x54a   : > { %v1365_v41 = vadd.f32 %v1364_v0, %v2375_v21  ;;  %v1431_v21 = vpop.permute.xlu1 %1430 }
 0x54b   : > { %v1373_v52 = vmax.f32 %v1336_v39, 0.0  ;;  %v1433_v50 = vperm.slane %v1431_v21, 0 }
 0x54c   : > { %v1374_v45 = vmax.f32 %v1365_v41, 0.0 }
 0x54d   : > { %v1406_v20 = vmul.f32 %v1398_v13, %v1373_v52 }
 0x54e   : > { %v1407_v24 = vmul.f32 %v1398_v13, %v1374_v45 }
 0x54f   : > { %v1410_v37 = vadd.f32 %v1409_v14, %v1406_v20 }
 0x550   : > { %v1419_v25 = vadd.f32 %v1418_v56, %v1407_v24 }
 0x551   : > { %v1411_v29 = vrot.slane %v1410_v37, 4 }
 0x552   : > { %v1420_v30 = vrot.slane %v1419_v25, 4 }
 0x553   : > { %v1412_v4 = vadd.f32 %v1411_v29, %v1410_v37 }
 0x554   : > { %v1421_v6 = vadd.f32 %v1420_v30, %v1419_v25 }
 0x555   : > { %v1413_v23 = vrot.slane %v1412_v4, 2 }
 0x556   : > { %v1422_v31 = vrot.slane %v1421_v6, 2 }
 0x557   : > { %v1414_v55 = vadd.f32 %v1413_v23, %v1412_v4 }
 0x558   : > { %v1423_v32 = vadd.f32 %v1422_v31, %v1421_v6 }
 0x559   : > { %v1415_v16 = vrot.slane %v1414_v55, 1 }
 0x55a   : > { %v1424_v17 = vrot.slane %v1423_v32, 1 }
 0x55b   : > { %v1416_v54 = vadd.f32 %v1415_v16, %v1414_v55 }
 0x55c   : > { %v1425_v53 = vadd.f32 %v1424_v17, %v1423_v32 }
 0x55d   : > { %v1434_v33 = vadd.f32 %v1433_v50, %v1416_v54 }
 0x55e   : > { %v1435_v5 = vadd.f32 %v1433_v50, %v1425_v53 }
 0x55f   : > { %v1436_v34 = vadd.f32 %v1434_v33, %v2395_v36 }
 0x560   : > { %v1437_v62 = vadd.f32 %v1435_v5, %v2397_v38 }
 0x561   : > { %v1702_v2 = vmul.f32 -1.442695, %v1436_v34 }
 0x562   : > { %v1703_v1 = vmul.f32 -1.442695, %v1437_v62 }
 0x563   : > { %1765 = vpow2.f32 %v1702_v2 }
 0x564   : > { %1767 = vpow2.f32 %v1703_v1 }
 0x569   : > { %v1766_v57 = vpop.eup %1765 }
 0x56a   : > { %v1768_v42 = vpop.eup %1767  ;;  %v1444_v43 = vadd.f32 1.0, %v1766_v57 }
 0x56b   : > { %v1445_v11 = vadd.f32 1.0, %v1768_v42 }
 0x56c   : > { %1769 = vrcp.f32 %v1444_v43  ;;  %v1457_v49 = vand.u32 2147483648, %v1444_v43  ;;  %v1455_v38 = vand.u32 2147483647, %v1444_v43  ;;  %vm1451_vm3 = vweird.f32 %v1444_v43 }
 0x56d   : > { %1771 = vrcp.f32 %v1445_v11  ;;  %v1472_v7 = vand.u32 2147483648, %v1445_v11  ;;  %v1470_v10 = vand.u32 2147483647, %v1445_v11  ;;  %vm1466_vm5 = vweird.f32 %v1445_v11 }
 0x56e   : > { %v1458_v22 = vor.u32 1.1754944e-38, %v1457_v49  ;;  %vm1456_vm6 = vcmp.eq.f32.partialorder %v1455_v38, 8.507059e+37 }
 0x56f   : > { %v1473_v44 = vor.u32 1.1754944e-38, %v1472_v7  ;;  %vm1471_vm8 = vcmp.eq.f32.partialorder %v1470_v10, 8.507059e+37 }
 0x572   : > { %v1770_v51 = vpop.eup %1769 }
 0x573   : > { %v1772_v12 = vpop.eup %1771  ;;  %v1447_v15 = vmul.f32 %v1770_v51, %v1444_v43  ;;  %vm1452_vm1 = vweird.f32 %v1770_v51 }
 0x574   : > { %v1462_v18 = vmul.f32 %v1772_v12, %v1445_v11  ;;  %vm1467_vm2 = vweird.f32 %v1772_v12  ;;  %vm1453_vm4 = vmor %vm1451_vm3, %vm1452_vm1 }
 0x575   : > { %v1448_v46 = vsub.f32 1.0, %v1447_v15  ;;  %vm1468_vm7 = vmor %vm1466_vm5, %vm1467_vm2 }
 0x576   : > { %v1463_v3 = vsub.f32 1.0, %v1462_v18 }
 0x577   : > { %v1449_v36 = vmul.f32 %v1770_v51, %v1448_v46 }
 0x578   : > { %v1464_v9 = vmul.f32 %v1772_v12, %v1463_v3 }
 0x579   : > { %v1450_v61 = vadd.f32 %v1770_v51, %v1449_v36 }
 0x57a   : > { %v1465_v58 = vadd.f32 %v1772_v12, %v1464_v9 }
 0x57b   : > { %v1454_v26 = vsel %vm1453_vm4, %v1770_v51, %v1450_v61 }
 0x57c   : > { %v1459_v27 = vsel %vm1456_vm6, %v1458_v22, %v1454_v26  ;;  %v1469_v28 = vsel %vm1468_vm7, %v1772_v12, %v1465_v58 }
 0x57d   : > { %1478 = vst [vmem:[#allocation1] sm:$0xff] %v1459_v27  ;;  %v1474_v59 = vsel %vm1471_vm8, %v1473_v44, %v1469_v28 }
 0x57e   : > { %1479 = vst [vmem:[#allocation1 + $0x9] sm:$0xff] %v1474_v59 }
 0x585   : > { %v1481_v35 = vld [vmem:[#allocation1 + $0x7] ss:$9 sm:$0xff] }
 0x586   : > { %1487 = vst.msk [vmem:[%s381_s17] sm:$0x3] %vm1485_vm9, %v1481_v35 }
 0x587   : > { %1830 = shalt.err (!%p1827_p9)
}
 0x588   : > { %1713 = dma.vmem_to_hbm [thread:$0]  (%p1968_p6), %s1502_s23, 32, %s1504_s24, %s1489_s13  }
 0x589 PF: > { %s1515_s19 = sand.u32 1, %s1857_s30   ;;  %p1720_p11 = pnand %p1584_p1, %p1974_p10 }
 0x58a   : > { %s1516_s16 = scalar_lea.sflag [#allocation5], %s1515_s19 }
 0x58b   : > { %p1721_p12 = pneg %p1720_p11 }
 0x58d   : > { %1852 = dma.done.wait (%p1721_p12), %s1516_s16, 32  }
 0x58e   : > { %1854 = vsyncadd (%p1721_p12), %s1516_s16, 4294967264  ;;  %p20_p13 = scmp.ge.s32.totalorder %s1950_s15, 4   ;;  %s2529_s30 = smov %s1861_s10 }
 0x58f   : > { %s2530_s10 = smov %s1865_s11  ;;  %s2531_s11 = smov %s1962_s18 }
 0x590   : > { %s2532_s12 = smov %s1950_s15  ;;  %22 = sbr.rel (!%p20_p13) target bundleno = 4 (0x4), region = 139 }
 0x595   :  { %1522 = vsyncpa [#allocation4], 1 }
 0x596   :  { %1524 = vsyncpa [#allocation4 + $0x1], 1 }
 0x597   :  { %1525 = vsyncpa [#allocation5], 1 }
 0x598   :  { %1527 = vsyncpa [#allocation5 + $0x1], 1 }

</bundles_post_ra>
